<compile_context>
chip_gen: v7x
topology: tpu7x:2x2x1
jax: 0.10.0
libtpu: 0.0.40
codegen_flags: <defaults>
</compile_context>

<pallas_src>
import jax
import jax.numpy as jnp
from jax.experimental import pallas as pl
from jax.experimental.pallas import tpu as pltpu

# ---------------- model configuration ----------------
D_IN = 7                        # numerical features (categories=None)
D = 32                          # residual width d
D_HIDDEN = int(D * 2.0)         # 64
D_LIN0_OUT = 2 * D_HIDDEN       # 128 (reglu doubles linear0's output)
N_LAYERS = 2
D_OUT = 1
EPS = 1e-5                      # torch.nn.LayerNorm default

TILE_B = 128                    # batch tile: fills MXU M dim, lane-dense store

# ------- single packed parameter slab: (R_TOTAL, 128) bfloat16 --------------
# matmul-weight row regions (16-row aligned for bf16 sublane packing):
ROW_WF = 0                                  # rows 0:7      w_first   (7, 32)
ROW_W0 = (16, 48)                           # 32 rows each  w0[l]     (32,128)
ROW_W1 = (80, 144)                          # 64 rows each  w1[l]     (64, 32)
ROW_WH = 208                                # 1 row         head w^T  (1, 32)
# bias / layernorm vectors, one row each:
ROW_B_FIRST = 209
ROW_VEC_BASE = 210                          # per layer l: gamma, beta, b0, b1
ROW_LAST_G = ROW_VEC_BASE + 4 * N_LAYERS    # 218  last_normalization gamma
ROW_LAST_B = ROW_LAST_G + 1                 # 219  last_normalization beta
ROW_BH = ROW_LAST_G + 2                     # 220  head bias
R_TOTAL = 224                               # padded to a multiple of 16


# ---------------- Pallas kernel ----------------
def resnet_kernel(x_ref, p_ref, o_ref):
    f32, bf16 = jnp.float32, jnp.bfloat16

    def vrow(r, width):
        # (1, width) f32 parameter row; each row is used exactly once.
        return p_ref[r:r + 1, 0:width].astype(f32)

    def layernorm(v, g_row, b_row):
        mu = jnp.mean(v, axis=-1, keepdims=True)
        var = jnp.mean((v - mu) ** 2, axis=-1, keepdims=True)
        return (v - mu) * jax.lax.rsqrt(var + EPS) * vrow(g_row, D) + vrow(b_row, D)

    # first_layer: (TILE_B, 7) @ (7, 32) + b_first   (K=7, MXU pads internally)
    xb = x_ref[...].astype(bf16)
    wf = p_ref[ROW_WF:ROW_WF + D_IN, 0:D]                          # (7, 32) bf16
    h = jnp.dot(xb, wf, preferred_element_type=f32) + vrow(ROW_B_FIRST, D)

    # residual blocks (n_layers is static -> unrolled)
    for l in range(N_LAYERS):
        vb = ROW_VEC_BASE + 4 * l
        z = layernorm(h, vb, vb + 1)
        w0 = p_ref[ROW_W0[l]:ROW_W0[l] + D, :]                     # (32,128) bf16
        z = jnp.dot(z.astype(bf16), w0, preferred_element_type=f32)
        z = z + vrow(vb + 2, D_LIN0_OUT)                           # linear0 bias
        a, b = z[:, :D_HIDDEN], z[:, D_HIDDEN:]
        z = a * jnp.maximum(b, 0.0)                                # reglu
        # hidden_dropout == 0.0 -> identity
        w1 = p_ref[ROW_W1[l]:ROW_W1[l] + D_HIDDEN, 0:D]            # (64, 32) bf16
        z = jnp.dot(z.astype(bf16), w1, preferred_element_type=f32)
        z = z + vrow(vb + 3, D)                                    # linear1 bias
        # residual_dropout == 0.0 -> identity
        h = h + z

    # head: last layernorm -> relu -> linear(d, d_out), computed as a
    # (D_OUT, TILE_B) slab so batch sits on the LANE axis (unmasked store).
    h = layernorm(h, ROW_LAST_G, ROW_LAST_B)
    h = jnp.maximum(h, 0.0)
    whT = p_ref[ROW_WH:ROW_WH + D_OUT, 0:D]                        # (1, 32) bf16
    out = jax.lax.dot_general(
        whT, h.astype(bf16),
        dimension_numbers=(((1,), (1,)), ((), ())),
        preferred_element_type=f32)                                # (1, TILE_B)
    o_ref[...] = out + vrow(ROW_BH, D_OUT)


# ---------------- wrapper ----------------
@jax.jit
def resnet_forward(x, param_slab):
    """x: (B, D_IN) float. param_slab: (R_TOTAL, 128) bf16. -> (B, D_OUT) f32."""
    B = x.shape[0]
    n_tiles = pl.cdiv(B, TILE_B)
    B_pad = n_tiles * TILE_B
    x = x.astype(jnp.float32)
    if B_pad != B:                                   # only if B % TILE_B != 0
        x = jnp.zeros((B_pad, D_IN), jnp.float32).at[:B, :].set(x)

    out_t = pl.pallas_call(
        resnet_kernel,
        grid=(n_tiles,),
        in_specs=[
            pl.BlockSpec((TILE_B, D_IN), lambda i: (i, 0)),
            # constant index map -> parameter slab stays VMEM-resident
            pl.BlockSpec((R_TOTAL, 128), lambda i: (0, 0)),
        ],
        out_specs=pl.BlockSpec((D_OUT, TILE_B), lambda i: (0, i)),
        out_shape=jax.ShapeDtypeStruct((D_OUT, B_pad), jnp.float32),
        compiler_params=pltpu.CompilerParams(
            dimension_semantics=("parallel",)),      # 2-TC sharding on v7x
    )(x, param_slab)
    return out_t.T[:B]                               # (B, D_OUT)


def pack_params(p):
    """Pack all raw params into ONE lane-dense bf16 slab (done once)."""
    s = jnp.zeros((R_TOTAL, 128), jnp.float32)
    s = s.at[ROW_WF:ROW_WF + D_IN, :D].set(p["w_first"])
    for l in range(N_LAYERS):
        s = s.at[ROW_W0[l]:ROW_W0[l] + D, :].set(p["w0"][l])
        s = s.at[ROW_W1[l]:ROW_W1[l] + D_HIDDEN, :D].set(p["w1"][l])
        vb = ROW_VEC_BASE + 4 * l
        s = s.at[vb, :D].set(p["ln_g"][l])
        s = s.at[vb + 1, :D].set(p["ln_b"][l])
        s = s.at[vb + 2, :D_LIN0_OUT].set(p["b0"][l])
        s = s.at[vb + 3, :D].set(p["b1"][l])
    s = s.at[ROW_WH, :D].set(p["wh"][:, 0])
    s = s.at[ROW_B_FIRST, :D].set(p["b_first"])
    s = s.at[ROW_LAST_G, :D].set(p["lng"])
    s = s.at[ROW_LAST_B, :D].set(p["lnb"])
    s = s.at[ROW_BH, :D_OUT].set(p["bh"])
    return s.astype(jnp.bfloat16)


# ---------------- pure-JAX reference (for validation) ----------------
def _layernorm(v, g, b):
    mu = jnp.mean(v, axis=-1, keepdims=True)
    var = jnp.mean((v - mu) ** 2, axis=-1, keepdims=True)
    return (v - mu) * jax.lax.rsqrt(var + EPS) * g + b


def reference_forward(x, p):
    h = x.astype(jnp.float32) @ p["w_first"] + p["b_first"]
    for l in range(N_LAYERS):
        z = _layernorm(h, p["ln_g"][l], p["ln_b"][l])
        z = z @ p["w0"][l] + p["b0"][l]
        a, b = z[:, :D_HIDDEN], z[:, D_HIDDEN:]
        z = a * jax.nn.relu(b)                       # reglu
        z = z @ p["w1"][l] + p["b1"][l]
        h = h + z
    h = _layernorm(h, p["lng"], p["lnb"])
    h = jax.nn.relu(h)
    return h @ p["wh"] + p["bh"]


# ---------------- deterministic parameter init ----------------
def make_params(key):
    def nrm(k, shape, scale=0.1):
        return scale * jax.random.normal(k, shape, dtype=jnp.float32)

    names_shapes = [
        ("w_first", (D_IN, D)), ("b_first", (D,)),
        ("w0", (N_LAYERS, D, D_LIN0_OUT)), ("b0", (N_LAYERS, D_LIN0_OUT)),
        ("w1", (N_LAYERS, D_HIDDEN, D)),   ("b1", (N_LAYERS, D)),
        ("wh", (D, D_OUT)), ("bh", (D_OUT,)),
    ]
    keys = jax.random.split(key, len(names_shapes) + 4)
    params = {n: nrm(k, s)
              for (n, s), k in zip(names_shapes, keys[:len(names_shapes)])}
    kk = keys[len(names_shapes):]
    params["ln_g"] = 1.0 + 0.1 * jax.random.normal(kk[0], (N_LAYERS, D), jnp.float32)
    params["ln_b"] = 0.1 * jax.random.normal(kk[1], (N_LAYERS, D), jnp.float32)
    params["lng"] = 1.0 + 0.1 * jax.random.normal(kk[2], (D,), jnp.float32)
    params["lnb"] = 0.1 * jax.random.normal(kk[3], (D,), jnp.float32)
    return params


if __name__ == "__main__":
    BATCH = 256                                      # 2 batch tiles of 128
    key = jax.random.PRNGKey(0)
    k_par, k_x = jax.random.split(key)
    params = make_params(k_par)
    slab = pack_params(params)                       # pack once, reuse per call
    x = jax.random.normal(k_x, (BATCH, D_IN), dtype=jnp.float32)

    out = jax.block_until_ready(resnet_forward(x, slab))
    assert out.shape == (BATCH, D_OUT)

    ref = jax.block_until_ready(reference_forward(x, params))
    # bf16 MXU operands + bf16-quantized parameters vs an f32 reference
    assert jnp.allclose(out, ref, atol=3e-2, rtol=3e-2), (
        f"mismatch: max abs diff {jnp.max(jnp.abs(out - ref))}")

    print("KERNEL_OK")
</pallas_src>

<mosaic_0001>
module attributes {stable_mosaic.version = 11 : i64} {
  func.func @resnet_kernel(%arg0: i32, %arg1: memref<128x7xf32, #tpu.memory_space<vmem>>, %arg2: memref<224x128xbf16, #tpu.memory_space<vmem>>, %arg3: memref<1x128xf32, #tpu.memory_space<vmem>>) attributes {dimension_semantics = [#tpu.dimension_semantics<parallel>], iteration_bounds = array<i64: 2>, scalar_prefetch = 0 : i64, scratch_operands = 0 : i64, tpu.core_type = #tpu.core_type<tc>, window_params = [{transform_indices = @transform_0, window_bounds = array<i64: 128, 7>}, {pipeline_mode = #tpu.pipeline_mode<synchronous>, transform_indices = @transform_1, window_bounds = array<i64: 224, 128>}, {transform_indices = @transform_2, window_bounds = array<i64: 1, 128>}]} {
    %c0 = arith.constant 0 : index
    %c0_0 = arith.constant 0 : index
    %0 = vector.load %arg1[%c0, %c0_0] : memref<128x7xf32, #tpu.memory_space<vmem>>, vector<128x7xf32>
    %1 = arith.truncf %0 : vector<128x7xf32> to vector<128x7xbf16>
    %c0_1 = arith.constant 0 : index
    %c0_2 = arith.constant 0 : index
    %2 = vector.load %arg2[%c0_1, %c0_2] : memref<224x128xbf16, #tpu.memory_space<vmem>>, vector<7x32xbf16>
    %cst = arith.constant dense<0.000000e+00> : vector<128x32xf32>
    %3 = tpu.matmul %1, %2, %cst {dimension_numbers = #tpu.dot_dimension_numbers<[1], [0], [0], [1], [0, 0, 1, 1], [], []>} : vector<128x7xbf16>, vector<7x32xbf16>, vector<128x32xf32> -> vector<128x32xf32>
    %c209 = arith.constant 209 : index
    %c0_3 = arith.constant 0 : index
    %4 = vector.load %arg2[%c209, %c0_3] : memref<224x128xbf16, #tpu.memory_space<vmem>>, vector<1x32xbf16>
    %5 = arith.extf %4 : vector<1x32xbf16> to vector<1x32xf32>
    %6 = vector.broadcast %5 : vector<1x32xf32> to vector<128x32xf32>
    %7 = arith.addf %3, %6 : vector<128x32xf32>
    %cst_4 = arith.constant dense<0.000000e+00> : vector<128xf32>
    %8 = vector.multi_reduction <add>, %7, %cst_4 [1] : vector<128x32xf32> to vector<128xf32>
    %9 = vector.shape_cast %8 : vector<128xf32> to vector<128x1xf32>
    %cst_5 = arith.constant 3.200000e+01 : f32
    %10 = vector.broadcast %cst_5 : f32 to vector<128x1xf32>
    %11 = arith.divf %9, %10 : vector<128x1xf32>
    %12 = vector.broadcast %11 : vector<128x1xf32> to vector<128x32xf32>
    %13 = arith.subf %7, %12 : vector<128x32xf32>
    %14 = arith.mulf %13, %13 : vector<128x32xf32>
    %cst_6 = arith.constant dense<0.000000e+00> : vector<128xf32>
    %15 = vector.multi_reduction <add>, %14, %cst_6 [1] : vector<128x32xf32> to vector<128xf32>
    %16 = vector.shape_cast %15 : vector<128xf32> to vector<128x1xf32>
    %cst_7 = arith.constant 3.200000e+01 : f32
    %17 = vector.broadcast %cst_7 : f32 to vector<128x1xf32>
    %18 = arith.divf %16, %17 : vector<128x1xf32>
    %19 = vector.broadcast %11 : vector<128x1xf32> to vector<128x32xf32>
    %20 = arith.subf %7, %19 : vector<128x32xf32>
    %cst_8 = arith.constant 9.99999974E-6 : f32
    %21 = vector.broadcast %cst_8 : f32 to vector<128x1xf32>
    %22 = arith.addf %18, %21 : vector<128x1xf32>
    %23 = math.rsqrt %22 : vector<128x1xf32>
    %24 = vector.broadcast %23 : vector<128x1xf32> to vector<128x32xf32>
    %25 = arith.mulf %20, %24 : vector<128x32xf32>
    %c210 = arith.constant 210 : index
    %c0_9 = arith.constant 0 : index
    %26 = vector.load %arg2[%c210, %c0_9] : memref<224x128xbf16, #tpu.memory_space<vmem>>, vector<1x32xbf16>
    %27 = arith.extf %26 : vector<1x32xbf16> to vector<1x32xf32>
    %28 = vector.broadcast %27 : vector<1x32xf32> to vector<128x32xf32>
    %29 = arith.mulf %25, %28 : vector<128x32xf32>
    %c211 = arith.constant 211 : index
    %c0_10 = arith.constant 0 : index
    %30 = vector.load %arg2[%c211, %c0_10] : memref<224x128xbf16, #tpu.memory_space<vmem>>, vector<1x32xbf16>
    %31 = arith.extf %30 : vector<1x32xbf16> to vector<1x32xf32>
    %32 = vector.broadcast %31 : vector<1x32xf32> to vector<128x32xf32>
    %33 = arith.addf %29, %32 : vector<128x32xf32>
    %c16 = arith.constant 16 : index
    %c0_11 = arith.constant 0 : index
    %34 = vector.load %arg2[%c16, %c0_11] : memref<224x128xbf16, #tpu.memory_space<vmem>>, vector<32x128xbf16>
    %35 = arith.truncf %33 : vector<128x32xf32> to vector<128x32xbf16>
    %cst_12 = arith.constant dense<0.000000e+00> : vector<128x128xf32>
    %36 = tpu.matmul %35, %34, %cst_12 {dimension_numbers = #tpu.dot_dimension_numbers<[1], [0], [0], [1], [0, 0, 1, 1], [], []>} : vector<128x32xbf16>, vector<32x128xbf16>, vector<128x128xf32> -> vector<128x128xf32>
    %c212 = arith.constant 212 : index
    %c0_13 = arith.constant 0 : index
    %37 = vector.load %arg2[%c212, %c0_13] : memref<224x128xbf16, #tpu.memory_space<vmem>>, vector<1x128xbf16>
    %38 = arith.extf %37 : vector<1x128xbf16> to vector<1x128xf32>
    %39 = vector.broadcast %38 : vector<1x128xf32> to vector<128x128xf32>
    %40 = arith.addf %36, %39 : vector<128x128xf32>
    %41 = vector.extract_strided_slice %40 {offsets = [0, 0], sizes = [128, 64], strides = [1, 1]} : vector<128x128xf32> to vector<128x64xf32>
    %42 = vector.extract_strided_slice %40 {offsets = [0, 64], sizes = [128, 64], strides = [1, 1]} : vector<128x128xf32> to vector<128x64xf32>
    %cst_14 = arith.constant 0.000000e+00 : f32
    %43 = vector.broadcast %cst_14 : f32 to vector<128x64xf32>
    %44 = arith.maximumf %42, %43 : vector<128x64xf32>
    %45 = arith.mulf %41, %44 : vector<128x64xf32>
    %c80 = arith.constant 80 : index
    %c0_15 = arith.constant 0 : index
    %46 = vector.load %arg2[%c80, %c0_15] : memref<224x128xbf16, #tpu.memory_space<vmem>>, vector<64x32xbf16>
    %47 = arith.truncf %45 : vector<128x64xf32> to vector<128x64xbf16>
    %cst_16 = arith.constant dense<0.000000e+00> : vector<128x32xf32>
    %48 = tpu.matmul %47, %46, %cst_16 {dimension_numbers = #tpu.dot_dimension_numbers<[1], [0], [0], [1], [0, 0, 1, 1], [], []>} : vector<128x64xbf16>, vector<64x32xbf16>, vector<128x32xf32> -> vector<128x32xf32>
    %c213 = arith.constant 213 : index
    %c0_17 = arith.constant 0 : index
    %49 = vector.load %arg2[%c213, %c0_17] : memref<224x128xbf16, #tpu.memory_space<vmem>>, vector<1x32xbf16>
    %50 = arith.extf %49 : vector<1x32xbf16> to vector<1x32xf32>
    %51 = vector.broadcast %50 : vector<1x32xf32> to vector<128x32xf32>
    %52 = arith.addf %48, %51 : vector<128x32xf32>
    %53 = arith.addf %7, %52 : vector<128x32xf32>
    %cst_18 = arith.constant dense<0.000000e+00> : vector<128xf32>
    %54 = vector.multi_reduction <add>, %53, %cst_18 [1] : vector<128x32xf32> to vector<128xf32>
    %55 = vector.shape_cast %54 : vector<128xf32> to vector<128x1xf32>
    %cst_19 = arith.constant 3.200000e+01 : f32
    %56 = vector.broadcast %cst_19 : f32 to vector<128x1xf32>
    %57 = arith.divf %55, %56 : vector<128x1xf32>
    %58 = vector.broadcast %57 : vector<128x1xf32> to vector<128x32xf32>
    %59 = arith.subf %53, %58 : vector<128x32xf32>
    %60 = arith.mulf %59, %59 : vector<128x32xf32>
    %cst_20 = arith.constant dense<0.000000e+00> : vector<128xf32>
    %61 = vector.multi_reduction <add>, %60, %cst_20 [1] : vector<128x32xf32> to vector<128xf32>
    %62 = vector.shape_cast %61 : vector<128xf32> to vector<128x1xf32>
    %cst_21 = arith.constant 3.200000e+01 : f32
    %63 = vector.broadcast %cst_21 : f32 to vector<128x1xf32>
    %64 = arith.divf %62, %63 : vector<128x1xf32>
    %65 = vector.broadcast %57 : vector<128x1xf32> to vector<128x32xf32>
    %66 = arith.subf %53, %65 : vector<128x32xf32>
    %cst_22 = arith.constant 9.99999974E-6 : f32
    %67 = vector.broadcast %cst_22 : f32 to vector<128x1xf32>
    %68 = arith.addf %64, %67 : vector<128x1xf32>
    %69 = math.rsqrt %68 : vector<128x1xf32>
    %70 = vector.broadcast %69 : vector<128x1xf32> to vector<128x32xf32>
    %71 = arith.mulf %66, %70 : vector<128x32xf32>
    %c214 = arith.constant 214 : index
    %c0_23 = arith.constant 0 : index
    %72 = vector.load %arg2[%c214, %c0_23] : memref<224x128xbf16, #tpu.memory_space<vmem>>, vector<1x32xbf16>
    %73 = arith.extf %72 : vector<1x32xbf16> to vector<1x32xf32>
    %74 = vector.broadcast %73 : vector<1x32xf32> to vector<128x32xf32>
    %75 = arith.mulf %71, %74 : vector<128x32xf32>
    %c215 = arith.constant 215 : index
    %c0_24 = arith.constant 0 : index
    %76 = vector.load %arg2[%c215, %c0_24] : memref<224x128xbf16, #tpu.memory_space<vmem>>, vector<1x32xbf16>
    %77 = arith.extf %76 : vector<1x32xbf16> to vector<1x32xf32>
    %78 = vector.broadcast %77 : vector<1x32xf32> to vector<128x32xf32>
    %79 = arith.addf %75, %78 : vector<128x32xf32>
    %c48 = arith.constant 48 : index
    %c0_25 = arith.constant 0 : index
    %80 = vector.load %arg2[%c48, %c0_25] : memref<224x128xbf16, #tpu.memory_space<vmem>>, vector<32x128xbf16>
    %81 = arith.truncf %79 : vector<128x32xf32> to vector<128x32xbf16>
    %cst_26 = arith.constant dense<0.000000e+00> : vector<128x128xf32>
    %82 = tpu.matmul %81, %80, %cst_26 {dimension_numbers = #tpu.dot_dimension_numbers<[1], [0], [0], [1], [0, 0, 1, 1], [], []>} : vector<128x32xbf16>, vector<32x128xbf16>, vector<128x128xf32> -> vector<128x128xf32>
    %c216 = arith.constant 216 : index
    %c0_27 = arith.constant 0 : index
    %83 = vector.load %arg2[%c216, %c0_27] : memref<224x128xbf16, #tpu.memory_space<vmem>>, vector<1x128xbf16>
    %84 = arith.extf %83 : vector<1x128xbf16> to vector<1x128xf32>
    %85 = vector.broadcast %84 : vector<1x128xf32> to vector<128x128xf32>
    %86 = arith.addf %82, %85 : vector<128x128xf32>
    %87 = vector.extract_strided_slice %86 {offsets = [0, 0], sizes = [128, 64], strides = [1, 1]} : vector<128x128xf32> to vector<128x64xf32>
    %88 = vector.extract_strided_slice %86 {offsets = [0, 64], sizes = [128, 64], strides = [1, 1]} : vector<128x128xf32> to vector<128x64xf32>
    %cst_28 = arith.constant 0.000000e+00 : f32
    %89 = vector.broadcast %cst_28 : f32 to vector<128x64xf32>
    %90 = arith.maximumf %88, %89 : vector<128x64xf32>
    %91 = arith.mulf %87, %90 : vector<128x64xf32>
    %c144 = arith.constant 144 : index
    %c0_29 = arith.constant 0 : index
    %92 = vector.load %arg2[%c144, %c0_29] : memref<224x128xbf16, #tpu.memory_space<vmem>>, vector<64x32xbf16>
    %93 = arith.truncf %91 : vector<128x64xf32> to vector<128x64xbf16>
    %cst_30 = arith.constant dense<0.000000e+00> : vector<128x32xf32>
    %94 = tpu.matmul %93, %92, %cst_30 {dimension_numbers = #tpu.dot_dimension_numbers<[1], [0], [0], [1], [0, 0, 1, 1], [], []>} : vector<128x64xbf16>, vector<64x32xbf16>, vector<128x32xf32> -> vector<128x32xf32>
    %c217 = arith.constant 217 : index
    %c0_31 = arith.constant 0 : index
    %95 = vector.load %arg2[%c217, %c0_31] : memref<224x128xbf16, #tpu.memory_space<vmem>>, vector<1x32xbf16>
    %96 = arith.extf %95 : vector<1x32xbf16> to vector<1x32xf32>
    %97 = vector.broadcast %96 : vector<1x32xf32> to vector<128x32xf32>
    %98 = arith.addf %94, %97 : vector<128x32xf32>
    %99 = arith.addf %53, %98 : vector<128x32xf32>
    %cst_32 = arith.constant dense<0.000000e+00> : vector<128xf32>
    %100 = vector.multi_reduction <add>, %99, %cst_32 [1] : vector<128x32xf32> to vector<128xf32>
    %101 = vector.shape_cast %100 : vector<128xf32> to vector<128x1xf32>
    %cst_33 = arith.constant 3.200000e+01 : f32
    %102 = vector.broadcast %cst_33 : f32 to vector<128x1xf32>
    %103 = arith.divf %101, %102 : vector<128x1xf32>
    %104 = vector.broadcast %103 : vector<128x1xf32> to vector<128x32xf32>
    %105 = arith.subf %99, %104 : vector<128x32xf32>
    %106 = arith.mulf %105, %105 : vector<128x32xf32>
    %cst_34 = arith.constant dense<0.000000e+00> : vector<128xf32>
    %107 = vector.multi_reduction <add>, %106, %cst_34 [1] : vector<128x32xf32> to vector<128xf32>
    %108 = vector.shape_cast %107 : vector<128xf32> to vector<128x1xf32>
    %cst_35 = arith.constant 3.200000e+01 : f32
    %109 = vector.broadcast %cst_35 : f32 to vector<128x1xf32>
    %110 = arith.divf %108, %109 : vector<128x1xf32>
    %111 = vector.broadcast %103 : vector<128x1xf32> to vector<128x32xf32>
    %112 = arith.subf %99, %111 : vector<128x32xf32>
    %cst_36 = arith.constant 9.99999974E-6 : f32
    %113 = vector.broadcast %cst_36 : f32 to vector<128x1xf32>
    %114 = arith.addf %110, %113 : vector<128x1xf32>
    %115 = math.rsqrt %114 : vector<128x1xf32>
    %116 = vector.broadcast %115 : vector<128x1xf32> to vector<128x32xf32>
    %117 = arith.mulf %112, %116 : vector<128x32xf32>
    %c218 = arith.constant 218 : index
    %c0_37 = arith.constant 0 : index
    %118 = vector.load %arg2[%c218, %c0_37] : memref<224x128xbf16, #tpu.memory_space<vmem>>, vector<1x32xbf16>
    %119 = arith.extf %118 : vector<1x32xbf16> to vector<1x32xf32>
    %120 = vector.broadcast %119 : vector<1x32xf32> to vector<128x32xf32>
    %121 = arith.mulf %117, %120 : vector<128x32xf32>
    %c219 = arith.constant 219 : index
    %c0_38 = arith.constant 0 : index
    %122 = vector.load %arg2[%c219, %c0_38] : memref<224x128xbf16, #tpu.memory_space<vmem>>, vector<1x32xbf16>
    %123 = arith.extf %122 : vector<1x32xbf16> to vector<1x32xf32>
    %124 = vector.broadcast %123 : vector<1x32xf32> to vector<128x32xf32>
    %125 = arith.addf %121, %124 : vector<128x32xf32>
    %cst_39 = arith.constant 0.000000e+00 : f32
    %126 = vector.broadcast %cst_39 : f32 to vector<128x32xf32>
    %127 = arith.maximumf %125, %126 : vector<128x32xf32>
    %c208 = arith.constant 208 : index
    %c0_40 = arith.constant 0 : index
    %128 = vector.load %arg2[%c208, %c0_40] : memref<224x128xbf16, #tpu.memory_space<vmem>>, vector<1x32xbf16>
    %129 = arith.truncf %127 : vector<128x32xf32> to vector<128x32xbf16>
    %cst_41 = arith.constant dense<0.000000e+00> : vector<1x128xf32>
    %130 = tpu.matmul %128, %129, %cst_41 {dimension_numbers = #tpu.dot_dimension_numbers<[1], [1], [0], [0], [0, 0, 1, 0], [], []>} : vector<1x32xbf16>, vector<128x32xbf16>, vector<1x128xf32> -> vector<1x128xf32>
    %c220 = arith.constant 220 : index
    %c0_42 = arith.constant 0 : index
    %131 = vector.load %arg2[%c220, %c0_42] : memref<224x128xbf16, #tpu.memory_space<vmem>>, vector<1x1xbf16>
    %132 = arith.extf %131 : vector<1x1xbf16> to vector<1x1xf32>
    %133 = vector.broadcast %132 : vector<1x1xf32> to vector<1x128xf32>
    %134 = arith.addf %130, %133 : vector<1x128xf32>
    %c0_43 = arith.constant 0 : index
    %c0_44 = arith.constant 0 : index
    %135 = vector.load %arg3[%c0_43, %c0_44] : memref<1x128xf32, #tpu.memory_space<vmem>>, vector<1x128xf32>
    tpu.vector_store %arg3[%c0_43, %c0_44], %134 {strides = array<i32>} : memref<1x128xf32, #tpu.memory_space<vmem>>, vector<1x128xf32>,
    return
  }
  func.func @transform_0(%arg0: i32) -> (i32, i32) {
    %c0_i32 = arith.constant 0 : i32
    %c0_i32_0 = arith.constant 0 : i32
    return %arg0, %c0_i32 : i32, i32
  }
  func.func @transform_1(%arg0: i32) -> (i32, i32) {
    %c0_i32 = arith.constant 0 : i32
    %c0_i32_0 = arith.constant 0 : i32
    %c0_i32_1 = arith.constant 0 : i32
    return %c0_i32, %c0_i32_0 : i32, i32
  }
  func.func @transform_2(%arg0: i32) -> (i32, i32) {
    %c0_i32 = arith.constant 0 : i32
    %c0_i32_0 = arith.constant 0 : i32
    return %c0_i32, %arg0 : i32, i32
  }
}

</mosaic_0001>

<bundles_post_ra>
// kernel: resnet_forward.1
= control target key start
LH: loop header
LB: loop body
LE: loop exit
PB: predicated region body
PF: predicated region fallthrough
CT: control target
= control target key end

     0   :  { %7 = vsyncpa [#allocation3], 0  ;;  %s3604_s0 = inlined_call_operand.vmem [shape: f32[256,7], index: 0, kind: input, shape index: {}]   ;;  %s3605_s1 = inlined_call_operand.vmem [shape: bf16[224,128], index: 1, kind: input, shape index: {}]   ;;  %s3606_s2 = inlined_call_operand.hbm [shape: f32[1,256], index: 2, kind: output, shape index: {}]  }
   0x1   :  { %9 = vsyncpa [#allocation3 + $0x1], 0  ;;  %s2570_s9 = smov 0   ;;  %s2572_s10 = smov 0  }
   0x2   :  { %s2574_s11 = smov 0   ;;  %s2576_s12 = smov 0  }
   0x3 LB: > { %s2080_s13 = sadd.s32 4294967295, %s2547_s12   ;;  %s2081_s14 = sadd.s32 4294967294, %s2547_s12   ;;  %s2547_s12 = sphi %s2576_s12, %s3612_s12   ;;  %s2543_s11 = sphi %s2574_s11, %s3611_s11   ;;  %s2539_s10 = sphi %s2572_s10, %s3610_s10   ;;  %s2535_s9 = sphi %s2570_s9, %s3609_s9  }
   0x4   : > { %s2593_s15 = sadd.s32 1, %s2547_s12   ;;  %s69_s16 = sadd.s32 1, %s2543_s11 }
   0x5   : > { %s66_s17 = ssub.s32 %s2547_s12, %s2593_s15  ;;  %p79_p0 = scmp.ne.s32.totalorder %s2543_s11, %s2539_s10 }
   0x6   : > { %p67_p1 = scmp.eq.s32.totalorder %s66_s17, 0  ;;  %p80_p2 = scmp.eq.s32.totalorder %s2080_s13, 1 }
   0x7   : > { %p85_p3 = scmp.ne.s32.totalorder %s2539_s10, %s2535_s9  ;;  %p86_p4 = scmp.eq.s32.totalorder %s2081_s14, 1 }
   0x8   : > { %s2603_s18 = scalar_select %p67_p1, %s2543_s11, %s69_s16  }
   0x9   : > { %p2605_p5 = por %p80_p2, %p79_p0  ;;  %p2609_p6 = por %p86_p4, %p85_p3 }
   0xa   : > { %p2084_p7 = scmp.ge.s32.totalorder %s2547_s12, 1  ;;  %p116_p8 = scmp.lt.s32.totalorder %s2547_s12, 3 }
   0xc   : > { %p117_p9 = pnand %p2084_p7, %p116_p8 }
   0xd   : > { %v168_v0 = vld [vmem:[%s3605_s1] sm:$0xf] (!%p117_p9)  ;;  %vm200_vm0 = vcmask (!%p117_p9), 1042432   ;;  %vm201_vm1 = vcmask (!%p117_p9), 1043456   ;;  %s2618_s23 = sshll.u32 (!%p117_p9), %s2080_s13, 4  ;;  %v2549_v1 = vmov (!%p117_p9), 65535   ;;  %v171_v29 = vlaneseq (!%p117_p9) }
   0xe   : > { %120 = sbr.rel (%p117_p9) target bundleno = 2621 (0xa3d), region = 28  ;;  %v202_v2 = vsel (!%p117_p9), %vm200_vm0, 4294967295, %v2549_v1  ;;  %p138_p10 = scmp.lt.s32.totalorder (!%p117_p9), %s2618_s23, 31  ;;  %vm175_vm2 = vcmask (!%p117_p9), 56320   ;;  %v169_v31 = vld [vmem:[%s3605_s1 + $0x68] sm:$0x1] (!%p117_p9) }
   0xf   : > { %v203_v3 = vsel (!%p117_p9), %vm201_vm1, %v202_v2, 0  ;;  %v2651_v30 = vshrl.u32 (!%p117_p9), %v171_v29, 7  ;;  %v170_v32 = vunpack.c.l.bf16 (!%p117_p9), %v169_v31  ;;  %vm304_vm3 = vcmask (!%p117_p9), 261120   ;;  %s135_s4 = sand.u32 (!%p117_p9), 1, %s2539_s10   ;;  %s3562_s13 = scalar_lea.hbm (!%p117_p9), %s3606_s2, %s2618_s23 }
  0x10   : > { %v205_v4 = vand.u32 (!%p117_p9), %v203_v3, %v168_v0  ;;  %vm847_vm4 = vcmask (!%p117_p9), 523264   ;;  %vm2552_vm5 = vmmov (!%p117_p9), 0   ;;  %s136_s5 = scalar_lea.vmem (!%p117_p9), [#allocation2], %s135_s4  ;;  %s2014_s14 = scalar_lea.sflag (!%p117_p9), [#allocation3], %s135_s4 }
  0x11   : > { %v173_v33 = vsub.s32 (!%p117_p9), 1, %v2651_v30  ;;  %s2026_s6 = sshll.u32 (!%p117_p9), %s136_s5, 4  ;;  %s2554_s17 = smov (!%p117_p9), [#allocation2]   ;;  %s3564_s6 = int_to_ptr.vmem [resolvable:$true] %s2026_s6 }
  0x12   : > { %2205 = vmatprep.subr.bf16.mxu0 (!%p117_p9), %v205_v4  ;;  %s2485_s16 = scalar_lea.vmem (!%p117_p9), %s3564_s6, 16  ;;  %s2489_s21 = sshll.u32 (!%p117_p9), %s2554_s17, 4  ;;  %s2490_s21 = int_to_ptr.vmem [resolvable:$false] %s2489_s21 }
  0x13   : > { %2206 = vmatpush3.bf16.msra.mxu0 (!%p117_p9), %v205_v4  ;;  %v174_v34 = vrot.slane (!%p117_p9), %v170_v32, %v173_v33  ;;  %p2486_p11 = scmp.ne.s32.totalorder (!%p117_p9), %s3564_s6, %s2485_s16  ;;  %s2491_s22 = scalar_lea.vmem (!%p117_p9), %s2490_s21, 32 }
  0x14   : > { %p2492_p0 = scmp.lt.s32.totalorder (!%p117_p9), %s3564_s6, %s2490_s21  ;;  %p2493_p1 = scmp.lt.s32.totalorder (!%p117_p9), %s2491_s22, %s2485_s16 }
  0x15   : > { %s139_s24 = scalar_select %p138_p10, %s2618_s23, 31 }
  0x16   : > { %p2487_p12 = pnand %p2486_p11, %p2605_p5  ;;  %p2494_p2 = por %p2493_p1, %p2492_p0 }
  0x17   : > { %s2086_s25 = sshll.u32 %s139_s24, 3 }
  0x18   : > { %s2625_s28 = scalar_lea.vmem %s3604_s0, %s2086_s25  ;;  %p2488_p13 = pneg %p2487_p12 }
  0x19   : > { %v144_v5 = vld [vmem:[%s2625_s28] sm:$0xff]  ;;  %v145_v6 = vld [vmem:[%s2625_s28 + $0x8] sm:$0xff]  ;;  %v146_v7 = vld [vmem:[%s2625_s28 + $0x10] sm:$0xff] }
  0x1a   : > { %v160_v8 = vpack.c.bf16 %v145_v6, %v144_v5  ;;  %v147_v9 = vld [vmem:[%s2625_s28 + $0x18] sm:$0xff]  ;;  %v148_v10 = vld [vmem:[%s2625_s28 + $0x20] sm:$0xff]  ;;  %v149_v11 = vld [vmem:[%s2625_s28 + $0x28] sm:$0xff]  ;;  %p2495_p3 = pnand %p2494_p2, %p2488_p13 }
  0x1b   : > { %v161_v12 = vpack.c.bf16 %v147_v9, %v146_v7  ;;  %v162_v13 = vpack.c.bf16 %v149_v11, %v148_v10  ;;  %v150_v14 = vld [vmem:[%s2625_s28 + $0x30] sm:$0xff]  ;;  %v151_v15 = vld [vmem:[%s2625_s28 + $0x38] sm:$0xff]  ;;  %v152_v16 = vld [vmem:[%s2625_s28 + $0x40] sm:$0xff] }
  0x1c   : > { %2207 = vmatprep.mubr.msk.bf16.mxu0 %vm175_vm2, %v160_v8  ;;  %v153_v17 = vld [vmem:[%s2625_s28 + $0x48] sm:$0xff]  ;;  %v163_v18 = vpack.c.bf16 %v151_v15, %v150_v14  ;;  %v154_v20 = vld [vmem:[%s2625_s28 + $0x50] sm:$0xff]  ;;  %v155_v21 = vld [vmem:[%s2625_s28 + $0x58] sm:$0xff] }
  0x1d   : > { %2208 = vmatmul.mubr.msk.bf16.vlgmr.msra.gmra.mrb[0].mxu0 %vm175_vm2, %v161_v12  ;;  %v164_v19 = vpack.c.bf16 %v153_v17, %v152_v16  ;;  %v156_v22 = vld [vmem:[%s2625_s28 + $0x60] sm:$0xff]  ;;  %v157_v23 = vld [vmem:[%s2625_s28 + $0x68] sm:$0xff]  ;;  %v165_v24 = vpack.c.bf16 %v155_v21, %v154_v20  ;;  %v158_v26 = vld [vmem:[%s2625_s28 + $0x70] sm:$0xff] }
  0x1e   : > { %2211 = vmatprep.mubr.msk.bf16.mxu0 %vm175_vm2, %v162_v13  ;;  %v166_v25 = vpack.c.bf16 %v157_v23, %v156_v22  ;;  %v159_v27 = vld [vmem:[%s2625_s28 + $0x78] sm:$0xff]  ;;  %s2550_s28 = smov 64  }
  0x1f   : > { %v167_v28 = vpack.c.bf16 %v159_v27, %v158_v26 }
  0x25   : > { %2212 = vmatmul.mubr.msk.bf16.gmra.mrb[4].mxu0 %vm175_vm2, %v163_v18 }
  0x26   : > { %2215 = vmatprep.mubr.msk.bf16.mxu0 %vm175_vm2, %v164_v19 }
  0x2d   : > { %2216 = vmatmul.mubr.msk.bf16.gmra.mrb[8].mxu0 %vm175_vm2, %v165_v24 }
  0x2e   : > { %2219 = vmatprep.mubr.msk.bf16.mxu0 %vm175_vm2, %v166_v25 }
  0x35   : > { %2220 = vmatmul.mubr.msk.bf16.gmra.mrb[12].mxu0 %vm175_vm2, %v167_v28 }
  0xf0   : > { %v2209_v35 = vpop.f32.mrb[0].mxu0 }
  0xf1   : > { %v2659_v36 = vadd.f32 %v2209_v35, %v174_v34  ;;  %v241_v37 = vpop.f32.mrb[1].mxu0 }
  0xf2   : > { %v2661_v38 = vadd.f32 %v241_v37, %v174_v34  ;;  %v2210_v39 = vpop.f32.mrb[2].mxu0 }
  0xf3   : > { %v2663_v40 = vadd.f32 %v2210_v39, %v174_v34  ;;  %v244_v41 = vpop.f32.mrb[3].mxu0  ;;  %v311_v42 = vsel %vm304_vm3, %v2659_v36, 0.0 }
  0xf4   : > { %v2667_v43 = vadd.f32 %v244_v41, %v174_v34  ;;  %312 = vadd.xlane.f32.xlu1 %v311_v42  ;;  %v305_v44 = vsel %vm304_vm3, %v2661_v38, 0.0 }
  0xf5   : > { %306 = vadd.xlane.f32.xlu0 %v305_v44  ;;  %v314_v45 = vsel %vm304_vm3, %v2663_v40, 0.0 }
  0xf6   : > { %v308_v47 = vsel %vm304_vm3, %v2667_v43, 0.0 }
  0xf8   : > { %315 = vadd.xlane.f32.xlu1 %v314_v45  ;;  %v2213_v46 = vpop.f32.mrb[4].mxu0 }
  0xf9   : > { %v257_v48 = vpop.f32.mrb[5].mxu0  ;;  %309 = vadd.xlane.f32.xlu0 %v308_v47  ;;  %v2675_v49 = vadd.f32 %v2213_v46, %v174_v34 }
  0xfa   : > { %v2677_v50 = vadd.f32 %v257_v48, %v174_v34  ;;  %v2214_v51 = vpop.f32.mrb[6].mxu0 }
  0xfb   : > { %v260_v52 = vpop.f32.mrb[7].mxu0  ;;  %v2679_v53 = vadd.f32 %v2214_v51, %v174_v34  ;;  %v323_v57 = vsel %vm304_vm3, %v2675_v49, 0.0 }
  0xfc   : > { %v2681_v54 = vadd.f32 %v260_v52, %v174_v34  ;;  %v317_v55 = vsel %vm304_vm3, %v2677_v50, 0.0 }
  0xfd   : > { %318 = vadd.xlane.f32.xlu0 %v317_v55  ;;  %v326_v59 = vsel %vm304_vm3, %v2679_v53, 0.0 }
  0xfe   : > { %v320_v56 = vsel %vm304_vm3, %v2681_v54, 0.0 }
  0xff   : > { %321 = vadd.xlane.f32.xlu1 %v320_v56 }
 0x100   : > { %v2217_v58 = vpop.f32.mrb[8].mxu0 }
 0x101   : > { %v273_v60 = vpop.f32.mrb[9].mxu0  ;;  %324 = vadd.xlane.f32.xlu0 %v323_v57  ;;  %v2691_v61 = vadd.f32 %v2217_v58, %v174_v34 }
 0x102   : > { %v2693_v62 = vadd.f32 %v273_v60, %v174_v34  ;;  %v2218_v63 = vpop.f32.mrb[10].mxu0 }
 0x103   : > { %v276_v0 = vpop.f32.mrb[11].mxu0  ;;  %327 = vadd.xlane.f32.xlu1 %v326_v59  ;;  %v2695_v1 = vadd.f32 %v2218_v63, %v174_v34  ;;  %v335_v5 = vsel %vm304_vm3, %v2691_v61, 0.0 }
 0x104   : > { %v2697_v2 = vadd.f32 %v276_v0, %v174_v34  ;;  %v329_v3 = vsel %vm304_vm3, %v2693_v62, 0.0 }
 0x105   : > { %330 = vadd.xlane.f32.xlu0 %v329_v3  ;;  %v338_v7 = vsel %vm304_vm3, %v2695_v1, 0.0 }
 0x106   : > { %v332_v4 = vsel %vm304_vm3, %v2697_v2, 0.0 }
 0x107   : > { %333 = vadd.xlane.f32.xlu1 %v332_v4 }
 0x108   : > { %v2221_v6 = vpop.f32.mrb[12].mxu0 }
 0x109   : > { %v289_v8 = vpop.f32.mrb[13].mxu0  ;;  %336 = vadd.xlane.f32.xlu0 %v335_v5  ;;  %v2707_v9 = vadd.f32 %v2221_v6, %v174_v34 }
 0x10a   : > { %v2709_v10 = vadd.f32 %v289_v8, %v174_v34  ;;  %v2222_v11 = vpop.f32.mrb[14].mxu0 }
 0x10b   : > { %v292_v12 = vpop.f32.mrb[15].mxu0  ;;  %339 = vadd.xlane.f32.xlu1 %v338_v7  ;;  %v2711_v13 = vadd.f32 %v2222_v11, %v174_v34  ;;  %v347_v17 = vsel %vm304_vm3, %v2707_v9, 0.0 }
 0x10c   : > { %v2713_v14 = vadd.f32 %v292_v12, %v174_v34  ;;  %v341_v15 = vsel %vm304_vm3, %v2709_v10, 0.0 }
 0x10d   : > { %342 = vadd.xlane.f32.xlu0 %v341_v15  ;;  %v350_v18 = vsel %vm304_vm3, %v2711_v13, 0.0 }
 0x10e   : > { %v344_v16 = vsel %vm304_vm3, %v2713_v14, 0.0 }
 0x10f   : > { %345 = vadd.xlane.f32.xlu1 %v344_v16 }
 0x111   : > { %348 = vadd.xlane.f32.xlu0 %v347_v17 }
 0x113   : > { %351 = vadd.xlane.f32.xlu1 %v350_v18 }
 0x181   : > { %v313_v19 = vpop.xlane.xlu1 %312 }
 0x182   : > { %v356_v20 = vmul.f32 0.03125, %v313_v19  ;;  %v307_v21 = vpop.xlane.xlu0 %306 }
 0x183   : > { %v354_v22 = vmul.f32 0.03125, %v307_v21 }
 0x184   : > { %v2724_v23 = vsub.f32 %v2659_v36, %v356_v20 }
 0x185   : > { %v2727_v24 = vsub.f32 %v2661_v38, %v354_v22  ;;  %v316_v25 = vpop.xlane.xlu1 %315 }
 0x186   : > { %v357_v26 = vmul.f32 0.03125, %v316_v25  ;;  %v310_v27 = vpop.xlane.xlu0 %309  ;;  %v388_v35 = vmul.f32 %v2724_v23, %v2724_v23 }
 0x187   : > { %v355_v28 = vmul.f32 0.03125, %v310_v27  ;;  %v386_v29 = vmul.f32 %v2727_v24, %v2727_v24 }
 0x188   : > { %v2732_v31 = vsub.f32 %v2663_v40, %v357_v26  ;;  %v408_v47 = vsel %vm304_vm3, %v388_v35, 0.0 }
 0x189   : > { %v2735_v32 = vsub.f32 %v2667_v43, %v355_v28  ;;  %v402_v34 = vsel %vm304_vm3, %v386_v29, 0.0 }
 0x18a   : > { %403 = vadd.xlane.f32.xlu0 %v402_v34  ;;  %v319_v37 = vpop.xlane.xlu0 %318  ;;  %v389_v44 = vmul.f32 %v2732_v31, %v2732_v31 }
 0x18b   : > { %v358_v39 = vmul.f32 0.03125, %v319_v37  ;;  %v387_v41 = vmul.f32 %v2735_v32, %v2735_v32 }
 0x18c   : > { %v322_v42 = vpop.xlane.xlu1 %321  ;;  %v411_v58 = vsel %vm304_vm3, %v389_v44, 0.0 }
 0x18d   : > { %v2745_v45 = vsub.f32 %v2677_v50, %v358_v39  ;;  %v359_v46 = vmul.f32 0.03125, %v322_v42  ;;  %v405_v48 = vsel %vm304_vm3, %v387_v41, 0.0 }
 0x18e   : > { %409 = vadd.xlane.f32.xlu0 %v408_v47  ;;  %406 = vadd.xlane.f32.xlu1 %v405_v48  ;;  %v325_v51 = vpop.xlane.xlu0 %324 }
 0x18f   : > { %v2750_v52 = vsub.f32 %v2681_v54, %v359_v46  ;;  %v360_v55 = vmul.f32 0.03125, %v325_v51  ;;  %v390_v56 = vmul.f32 %v2745_v45, %v2745_v45 }
 0x190   : > { %v328_v57 = vpop.xlane.xlu1 %327 }
 0x191   : > { %v2756_v59 = vsub.f32 %v2675_v49, %v360_v55  ;;  %v361_v60 = vmul.f32 0.03125, %v328_v57  ;;  %v414_v63 = vsel %vm304_vm3, %v390_v56, 0.0  ;;  %v391_v0 = vmul.f32 %v2750_v52, %v2750_v52 }
 0x192   : > { %412 = vadd.xlane.f32.xlu1 %v411_v58  ;;  %415 = vadd.xlane.f32.xlu0 %v414_v63  ;;  %v331_v3 = vpop.xlane.xlu0 %330 }
 0x193   : > { %v2762_v4 = vsub.f32 %v2679_v53, %v361_v60  ;;  %v362_v5 = vmul.f32 0.03125, %v331_v3  ;;  %v392_v6 = vmul.f32 %v2756_v59, %v2756_v59  ;;  %v417_v8 = vsel %vm304_vm3, %v391_v0, 0.0 }
 0x194   : > { %v334_v7 = vpop.xlane.xlu1 %333 }
 0x195   : > { %v2768_v11 = vsub.f32 %v2693_v62, %v362_v5  ;;  %v363_v12 = vmul.f32 0.03125, %v334_v7  ;;  %v420_v15 = vsel %vm304_vm3, %v392_v6, 0.0  ;;  %v393_v16 = vmul.f32 %v2762_v4, %v2762_v4 }
 0x196   : > { %418 = vadd.xlane.f32.xlu1 %v417_v8  ;;  %421 = vadd.xlane.f32.xlu0 %v420_v15  ;;  %v337_v17 = vpop.xlane.xlu0 %336 }
 0x197   : > { %v2774_v18 = vsub.f32 %v2697_v2, %v363_v12  ;;  %v364_v19 = vmul.f32 0.03125, %v337_v17  ;;  %v394_v20 = vmul.f32 %v2768_v11, %v2768_v11  ;;  %v423_v22 = vsel %vm304_vm3, %v393_v16, 0.0  ;;  %v2376_v16 = vld [vmem:[%s3605_s1 + $0x8] sm:$0xff]   ;;  %v2377_v17 = vld [vmem:[%s3605_s1 + $0x10] sm:$0xff]  }
 0x198   : > { %v340_v21 = vpop.xlane.xlu1 %339  ;;  %2223 = vmatprep.subr.bf16.mxu1 %v2376_v16 }
 0x199   : > { %v2780_v25 = vsub.f32 %v2691_v61, %v364_v19  ;;  %v365_v26 = vmul.f32 0.03125, %v340_v21  ;;  %v426_v27 = vsel %vm304_vm3, %v394_v20, 0.0  ;;  %v395_v28 = vmul.f32 %v2774_v18, %v2774_v18  ;;  %2224 = vmatpush3.bf16.msra.mxu1 %v2376_v16 }
 0x19a   : > { %424 = vadd.xlane.f32.xlu1 %v423_v22  ;;  %427 = vadd.xlane.f32.xlu0 %v426_v27  ;;  %v343_v29 = vpop.xlane.xlu0 %342 }
 0x19b   : > { %v2786_v34 = vsub.f32 %v2695_v1, %v365_v26  ;;  %v366_v35 = vmul.f32 0.03125, %v343_v29  ;;  %v396_v37 = vmul.f32 %v2780_v25, %v2780_v25  ;;  %v429_v41 = vsel %vm304_vm3, %v395_v28, 0.0  ;;  %2225 = vmatprep.subr.bf16.mxu1 %v2377_v17 }
 0x19c   : > { %v346_v39 = vpop.xlane.xlu1 %345 }
 0x19d   : > { %v2792_v42 = vsub.f32 %v2709_v10, %v366_v35  ;;  %v367_v44 = vmul.f32 0.03125, %v346_v39  ;;  %v432_v46 = vsel %vm304_vm3, %v396_v37, 0.0  ;;  %v397_v47 = vmul.f32 %v2786_v34, %v2786_v34  ;;  %2226 = vmatpush3.bf16.msra.mxu1 %v2377_v17 }
 0x19e   : > { %430 = vadd.xlane.f32.xlu1 %v429_v41  ;;  %433 = vadd.xlane.f32.xlu0 %v432_v46  ;;  %v349_v48 = vpop.xlane.xlu0 %348  ;;  %v514_v46 = vld [vmem:[%s3605_s1 + $0x68] sm:$0x2]  ;;  %v538_v17 = vsub.s32 3, %v2651_v30 }
 0x19f   : > { %v2798_v51 = vsub.f32 %v2713_v14, %v367_v44  ;;  %v368_v55 = vmul.f32 0.03125, %v349_v48  ;;  %v398_v56 = vmul.f32 %v2792_v42, %v2792_v42  ;;  %v435_v58 = vsel %vm304_vm3, %v397_v47, 0.0 }
 0x1a0   : > { %v352_v57 = vpop.xlane.xlu1 %351 }
 0x1a1   : > { %v2804_v60 = vsub.f32 %v2707_v9, %v368_v55  ;;  %v369_v63 = vmul.f32 0.03125, %v352_v57  ;;  %v438_v0 = vsel %vm304_vm3, %v398_v56, 0.0  ;;  %v399_v3 = vmul.f32 %v2798_v51, %v2798_v51 }
 0x1a2   : > { %436 = vadd.xlane.f32.xlu1 %v435_v58  ;;  %439 = vadd.xlane.f32.xlu0 %v438_v0  ;;  %v515_v57 = vunpack.c.l.bf16 %v514_v46  ;;  %v518_v58 = vsub.s32 2, %v2651_v30 }
 0x1a3   : > { %v2810_v5 = vsub.f32 %v2711_v13, %v369_v63  ;;  %v400_v6 = vmul.f32 %v2804_v60, %v2804_v60  ;;  %v441_v7 = vsel %vm304_vm3, %v399_v3, 0.0 }
 0x1a4   : > { %v2832_v16 = vrot.slane %v515_v57, %v518_v58 }
 0x1a5   : > { %v444_v8 = vsel %vm304_vm3, %v400_v6, 0.0  ;;  %v401_v12 = vmul.f32 %v2810_v5, %v2810_v5 }
 0x1a6   : > { %442 = vadd.xlane.f32.xlu1 %v441_v7  ;;  %445 = vadd.xlane.f32.xlu0 %v444_v8 }
 0x1a7   : > { %v447_v15 = vsel %vm304_vm3, %v401_v12, 0.0 }
 0x1aa   : > { %448 = vadd.xlane.f32.xlu1 %v447_v15 }
 0x217   : > { %v404_v19 = vpop.xlane.xlu0 %403 }
 0x218   : > { %v450_v20 = vmul.f32 0.03125, %v404_v19 }
 0x21a   : > { %v466_v21 = vadd.f32 1e-05, %v450_v20 }
 0x21b   : > { %v407_v22 = vpop.xlane.xlu1 %406  ;;  %v410_v26 = vpop.xlane.xlu0 %409 }
 0x21c   : > { %2388 = vrsqrt.f32 %v466_v21  ;;  %v451_v27 = vmul.f32 0.03125, %v407_v22  ;;  %v452_v28 = vmul.f32 0.03125, %v410_v26 }
 0x21e   : > { %v467_v29 = vadd.f32 1e-05, %v451_v27  ;;  %v468_v35 = vadd.f32 1e-05, %v452_v28 }
 0x21f   : > { %v413_v37 = vpop.xlane.xlu1 %412  ;;  %v416_v39 = vpop.xlane.xlu0 %415 }
 0x220   : > { %2390 = vrsqrt.f32 %v467_v29  ;;  %v453_v41 = vmul.f32 0.03125, %v413_v37  ;;  %v454_v44 = vmul.f32 0.03125, %v416_v39  ;;  %v2839_v37 = vrot.slane %v515_v57, %v538_v17 }
 0x221   : > { %2392 = vrsqrt.f32 %v468_v35 }
 0x222   : > { %v469_v47 = vadd.f32 1e-05, %v453_v41  ;;  %v470_v48 = vadd.f32 1e-05, %v454_v44 }
 0x223   : > { %v419_v55 = vpop.xlane.xlu1 %418  ;;  %v422_v56 = vpop.xlane.xlu0 %421 }
 0x224   : > { %2394 = vrsqrt.f32 %v469_v47  ;;  %v455_v63 = vmul.f32 0.03125, %v419_v55  ;;  %v456_v0 = vmul.f32 0.03125, %v422_v56 }
 0x225   : > { %2396 = vrsqrt.f32 %v470_v48 }
 0x226   : > { %v2389_v3 = vpop.eup %2388  ;;  %v471_v6 = vadd.f32 1e-05, %v455_v63  ;;  %v472_v7 = vadd.f32 1e-05, %v456_v0 }
 0x227   : > { %v425_v8 = vpop.xlane.xlu1 %424  ;;  %v428_v12 = vpop.xlane.xlu0 %427  ;;  %v498_v15 = vmul.f32 %v2389_v3, %v2727_v24 }
 0x228   : > { %2398 = vrsqrt.f32 %v471_v6  ;;  %v457_v19 = vmul.f32 0.03125, %v425_v8  ;;  %v458_v20 = vmul.f32 0.03125, %v428_v12 }
 0x229   : > { %2400 = vrsqrt.f32 %v472_v7  ;;  %v520_v24 = vmul.f32 %v2832_v16, %v498_v15 }
 0x22a   : > { %v2391_v21 = vpop.eup %2390  ;;  %v473_v22 = vadd.f32 1e-05, %v457_v19  ;;  %v474_v26 = vadd.f32 1e-05, %v458_v20 }
 0x22b   : > { %v2393_v27 = vpop.eup %2392  ;;  %v431_v28 = vpop.xlane.xlu1 %430  ;;  %v499_v35 = vmul.f32 %v2391_v21, %v2735_v32  ;;  %v540_v0 = vadd.f32 %v2839_v37, %v520_v24 }
 0x22c   : > { %v434_v29 = vpop.xlane.xlu0 %433  ;;  %2402 = vrsqrt.f32 %v473_v22  ;;  %v459_v39 = vmul.f32 0.03125, %v431_v28  ;;  %v500_v44 = vmul.f32 %v2393_v27, %v2724_v23 }
 0x22d   : > { %v460_v41 = vmul.f32 0.03125, %v434_v29  ;;  %2404 = vrsqrt.f32 %v474_v26  ;;  %v521_v46 = vmul.f32 %v2832_v16, %v499_v35 }
 0x22e   : > { %v2395_v47 = vpop.eup %2394  ;;  %v475_v48 = vadd.f32 1e-05, %v459_v39  ;;  %v522_v6 = vmul.f32 %v2832_v16, %v500_v44 }
 0x22f   : > { %v476_v55 = vadd.f32 1e-05, %v460_v41  ;;  %v2397_v56 = vpop.eup %2396  ;;  %v437_v63 = vpop.xlane.xlu1 %436  ;;  %v541_v3 = vadd.f32 %v2839_v37, %v521_v46  ;;  %v501_v57 = vmul.f32 %v2395_v47, %v2732_v31 }
 0x230   : > { %v440_v32 = vpop.xlane.xlu0 %439  ;;  %2406 = vrsqrt.f32 %v475_v48  ;;  %v461_v7 = vmul.f32 0.03125, %v437_v63  ;;  %v502_v15 = vmul.f32 %v2397_v56, %v2745_v45  ;;  %v542_v31 = vadd.f32 %v2839_v37, %v522_v6 }
 0x231   : > { %v462_v23 = vmul.f32 0.03125, %v440_v32  ;;  %2408 = vrsqrt.f32 %v476_v55  ;;  %v560_v8 = vpack.c.bf16 %v541_v3, %v540_v0  ;;  %v523_v12 = vmul.f32 %v2832_v16, %v501_v57 }
 0x232   : > { %v2399_v19 = vpop.eup %2398  ;;  %v477_v20 = vadd.f32 1e-05, %v461_v7  ;;  %v524_v35 = vmul.f32 %v2832_v16, %v502_v15 }
 0x233   : > { %v478_v21 = vadd.f32 1e-05, %v462_v23  ;;  %v2401_v22 = vpop.eup %2400  ;;  %v443_v26 = vpop.xlane.xlu1 %442  ;;  %2227 = vmatprep.mubr.msk.bf16.mxu1 %vm304_vm3, %v560_v8  ;;  %v543_v28 = vadd.f32 %v2839_v37, %v523_v12  ;;  %v503_v29 = vmul.f32 %v2399_v19, %v2750_v52 }
 0x234   : > { %v446_v27 = vpop.xlane.xlu0 %445  ;;  %2410 = vrsqrt.f32 %v477_v20  ;;  %v463_v24 = vmul.f32 0.03125, %v443_v26  ;;  %v504_v45 = vmul.f32 %v2401_v22, %v2756_v59  ;;  %v544_v52 = vadd.f32 %v2839_v37, %v524_v35 }
 0x235   : > { %v464_v39 = vmul.f32 0.03125, %v446_v27  ;;  %2412 = vrsqrt.f32 %v478_v21  ;;  %v561_v41 = vpack.c.bf16 %v543_v28, %v542_v31  ;;  %v525_v44 = vmul.f32 %v2832_v16, %v503_v29 }
 0x236   : > { %v2403_v46 = vpop.eup %2402  ;;  %v479_v47 = vadd.f32 1e-05, %v463_v24  ;;  %v526_v0 = vmul.f32 %v2832_v16, %v504_v45 }
 0x237   : > { %v480_v48 = vadd.f32 1e-05, %v464_v39  ;;  %v2405_v55 = vpop.eup %2404  ;;  %v449_v56 = vpop.xlane.xlu1 %448  ;;  %2228 = vmatmul.mubr.msk.bf16.vlgmr.msra.gmra.mrb[0].mxu1 %vm304_vm3, %v561_v41  ;;  %v545_v63 = vadd.f32 %v2839_v37, %v525_v44  ;;  %v505_v32 = vmul.f32 %v2403_v46, %v2762_v4 }
 0x238   : > { %2414 = vrsqrt.f32 %v479_v47  ;;  %v465_v59 = vmul.f32 0.03125, %v449_v56  ;;  %v506_v3 = vmul.f32 %v2405_v55, %v2768_v11  ;;  %v546_v12 = vadd.f32 %v2839_v37, %v526_v0 }
 0x239   : > { %2416 = vrsqrt.f32 %v480_v48  ;;  %v562_v57 = vpack.c.bf16 %v545_v63, %v544_v52  ;;  %v527_v6 = vmul.f32 %v2832_v16, %v505_v32 }
 0x23a   : > { %v2407_v7 = vpop.eup %2406  ;;  %v481_v23 = vadd.f32 1e-05, %v465_v59  ;;  %v528_v19 = vmul.f32 %v2832_v16, %v506_v3  ;;  %v2379_v3 = vld [vmem:[%s3605_s1 + $0x30] sm:$0xff]  }
 0x23b   : > { %v2409_v8 = vpop.eup %2408  ;;  %2231 = vmatprep.mubr.msk.bf16.mxu1 %vm304_vm3, %v562_v57  ;;  %v547_v15 = vadd.f32 %v2839_v37, %v527_v6  ;;  %v507_v4 = vmul.f32 %v2407_v7, %v2774_v18  ;;  %v572_v6 = vsub.s32 4, %v2651_v30  ;;  %v2381_v7 = vld [vmem:[%s3605_s1 + $0x40] sm:$0xff]  }
 0x23c   : > { %2418 = vrsqrt.f32 %v481_v23  ;;  %v508_v11 = vmul.f32 %v2409_v8, %v2780_v25  ;;  %v548_v27 = vadd.f32 %v2839_v37, %v528_v19 }
 0x23d   : > { %v563_v20 = vpack.c.bf16 %v547_v15, %v546_v12  ;;  %v529_v21 = vmul.f32 %v2832_v16, %v507_v4 }
 0x23e   : > { %v2411_v22 = vpop.eup %2410  ;;  %v530_v18 = vmul.f32 %v2832_v16, %v508_v11 }
 0x23f   : > { %v2413_v26 = vpop.eup %2412  ;;  %2232 = vmatmul.mubr.msk.bf16.gmra.mrb[4].mxu1 %vm304_vm3, %v563_v20  ;;  %v549_v31 = vadd.f32 %v2839_v37, %v529_v21  ;;  %v509_v28 = vmul.f32 %v2411_v22, %v2786_v34 }
 0x240   : > { %v510_v29 = vmul.f32 %v2413_v26, %v2792_v42  ;;  %v550_v45 = vadd.f32 %v2839_v37, %v530_v18 }
 0x241   : > { %v564_v35 = vpack.c.bf16 %v549_v31, %v548_v27  ;;  %v531_v25 = vmul.f32 %v2832_v16, %v509_v28 }
 0x242   : > { %v2415_v24 = vpop.eup %2414  ;;  %v532_v46 = vmul.f32 %v2832_v16, %v510_v29 }
 0x243   : > { %v2417_v39 = vpop.eup %2416  ;;  %2235 = vmatprep.mubr.msk.bf16.mxu1 %vm304_vm3, %v564_v35  ;;  %v551_v41 = vadd.f32 %v2839_v37, %v531_v25  ;;  %v511_v44 = vmul.f32 %v2415_v24, %v2798_v51 }
 0x244   : > { %v512_v34 = vmul.f32 %v2417_v39, %v2804_v60  ;;  %v552_v56 = vadd.f32 %v2839_v37, %v532_v46 }
 0x245   : > { %v565_v47 = vpack.c.bf16 %v551_v41, %v550_v45  ;;  %v533_v42 = vmul.f32 %v2832_v16, %v511_v44 }
 0x246   : > { %v2419_v48 = vpop.eup %2418  ;;  %v534_v63 = vmul.f32 %v2832_v16, %v512_v34 }
 0x247   : > { %v513_v55 = vmul.f32 %v2419_v48, %v2810_v5  ;;  %2236 = vmatmul.mubr.msk.bf16.gmra.mrb[8].mxu1 %vm304_vm3, %v565_v47  ;;  %v553_v52 = vadd.f32 %v2839_v37, %v533_v42  ;;  %v2378_v5 = vld [vmem:[%s3605_s1 + $0x28] sm:$0xff]  }
 0x248   : > { %v554_v60 = vadd.f32 %v2839_v37, %v534_v63  ;;  %2243 = vmatprep.subr.bf16.mxu0 %v2378_v5 }
 0x249   : > { %v566_v32 = vpack.c.bf16 %v553_v52, %v552_v56  ;;  %v535_v51 = vmul.f32 %v2832_v16, %v513_v55  ;;  %2244 = vmatpush3.bf16.msra.mxu0 %v2378_v5  ;;  %v2380_v16 = vld [vmem:[%s3605_s1 + $0x38] sm:$0xff]  }
 0x24a   : > { %2245 = vmatprep.subr.bf16.mxu0 %v2379_v3 }
 0x24b   : > { %2239 = vmatprep.mubr.msk.bf16.mxu1 %vm304_vm3, %v566_v32  ;;  %v555_v0 = vadd.f32 %v2839_v37, %v535_v51  ;;  %v2906_v37 = vld [vmem:[%s3605_s1 + $0x68] sm:$0x4] }
 0x24c   : > { %v569_v57 = vunpack.c.l.bf16 %v2906_v37 }
 0x24d   : > { %v567_v59 = vpack.c.bf16 %v555_v0, %v554_v60  ;;  %2246 = vmatpush3.bf16.msra.mxu0 %v2379_v3 }
 0x24e   : > { %2247 = vmatprep.subr.bf16.mxu0 %v2380_v16  ;;  %v573_v23 = vrot.slane %v569_v57, %v572_v6 }
 0x24f   : > { %2240 = vmatmul.mubr.msk.bf16.gmra.mrb[12].mxu1 %vm304_vm3, %v567_v59 }
 0x251   : > { %2248 = vmatpush3.bf16.msra.mxu0 %v2380_v16 }
 0x252   : > { %2249 = vmatprep.subr.bf16.mxu0 %v2381_v7 }
 0x255   : > { %2250 = vmatpush3.bf16.msra.mxu0 %v2381_v7 }
 0x30a   : > { %v2229_v8 = vpop.f32.mrb[0].mxu1 }
 0x30b   : > { %v2915_v12 = vadd.f32 %v2229_v8, %v573_v23  ;;  %v644_v15 = vpop.f32.mrb[1].mxu1 }
 0x30c   : > { %v2917_v4 = vadd.f32 %v644_v15, %v573_v23  ;;  %v2230_v19 = vpop.f32.mrb[2].mxu1 }
 0x30d   : > { %v709_v11 = vmax.f32 %v2915_v12, 0.0  ;;  %v647_v20 = vpop.f32.mrb[3].mxu1  ;;  %v656_v27 = vadd.f32 %v2230_v19, %v573_v23 }
 0x30e   : > { %v707_v21 = vmax.f32 %v2917_v4, 0.0  ;;  %v648_v22 = vadd.f32 %v647_v20, %v573_v23 }
 0x30f   : > { %743 = vrot.lane.b32.xlu1 %v709_v11, %s2550_s28  ;;  %v710_v35 = vmax.f32 %v656_v27, 0.0 }
 0x310   : > { %v708_v26 = vmax.f32 %v648_v22, 0.0  ;;  %739 = vrot.lane.b32.xlu0 %v707_v21, %s2550_s28 }
 0x312   : > { %v2233_v31 = vpop.f32.mrb[4].mxu1 }
 0x313   : > { %741 = vrot.lane.b32.xlu1 %v708_v26, %s2550_s28  ;;  %v660_v28 = vpop.f32.mrb[5].mxu1  ;;  %v2924_v24 = vadd.f32 %v2233_v31, %v573_v23 }
 0x314   : > { %v661_v18 = vadd.f32 %v660_v28, %v573_v23  ;;  %v2234_v29 = vpop.f32.mrb[6].mxu1 }
 0x315   : > { %v663_v25 = vpop.f32.mrb[7].mxu1  ;;  %v672_v44 = vadd.f32 %v2234_v29, %v573_v23  ;;  %v713_v46 = vmax.f32 %v2924_v24, 0.0 }
 0x316   : > { %v711_v39 = vmax.f32 %v661_v18, 0.0  ;;  %v664_v45 = vadd.f32 %v663_v25, %v573_v23 }
 0x317   : > { %745 = vrot.lane.b32.xlu1 %v710_v35, %s2550_s28  ;;  %v714_v55 = vmax.f32 %v672_v44, 0.0 }
 0x318   : > { %v712_v41 = vmax.f32 %v664_v45, 0.0  ;;  %747 = vrot.lane.b32.xlu0 %v711_v39, %s2550_s28 }
 0x31a   : > { %v2237_v34 = vpop.f32.mrb[8].mxu1 }
 0x31b   : > { %749 = vrot.lane.b32.xlu1 %v712_v41, %s2550_s28  ;;  %v676_v47 = vpop.f32.mrb[9].mxu1  ;;  %v685_v52 = vadd.f32 %v2237_v34, %v573_v23 }
 0x31c   : > { %v677_v42 = vadd.f32 %v676_v47, %v573_v23  ;;  %751 = vrot.lane.b32.xlu0 %v713_v46, %s2550_s28  ;;  %v2238_v48 = vpop.f32.mrb[10].mxu1 }
 0x31d   : > { %v679_v56 = vpop.f32.mrb[11].mxu1  ;;  %v688_v60 = vadd.f32 %v2238_v48, %v573_v23  ;;  %v717_v0 = vmax.f32 %v685_v52, 0.0 }
 0x31e   : > { %v715_v63 = vmax.f32 %v677_v42, 0.0  ;;  %v680_v32 = vadd.f32 %v679_v56, %v573_v23 }
 0x31f   : > { %753 = vrot.lane.b32.xlu1 %v714_v55, %s2550_s28  ;;  %v718_v6 = vmax.f32 %v688_v60, 0.0 }
 0x320   : > { %v716_v51 = vmax.f32 %v680_v32, 0.0  ;;  %755 = vrot.lane.b32.xlu0 %v715_v63, %s2550_s28 }
 0x322   : > { %v2241_v59 = vpop.f32.mrb[12].mxu1 }
 0x323   : > { %757 = vrot.lane.b32.xlu1 %v716_v51, %s2550_s28  ;;  %v692_v5 = vpop.f32.mrb[13].mxu1  ;;  %v701_v8 = vadd.f32 %v2241_v59, %v573_v23 }
 0x324   : > { %v693_v3 = vadd.f32 %v692_v5, %v573_v23  ;;  %759 = vrot.lane.b32.xlu0 %v717_v0, %s2550_s28  ;;  %v2242_v16 = vpop.f32.mrb[14].mxu1 }
 0x325   : > { %v695_v7 = vpop.f32.mrb[15].mxu1  ;;  %v704_v20 = vadd.f32 %v2242_v16, %v573_v23  ;;  %v721_v21 = vmax.f32 %v701_v8, 0.0 }
 0x326   : > { %v719_v15 = vmax.f32 %v693_v3, 0.0  ;;  %v696_v19 = vadd.f32 %v695_v7, %v573_v23 }
 0x327   : > { %761 = vrot.lane.b32.xlu1 %v718_v6, %s2550_s28  ;;  %v722_v26 = vmax.f32 %v704_v20, 0.0 }
 0x328   : > { %v720_v11 = vmax.f32 %v696_v19, 0.0  ;;  %763 = vrot.lane.b32.xlu0 %v719_v15, %s2550_s28 }
 0x32b   : > { %765 = vrot.lane.b32.xlu1 %v720_v11, %s2550_s28 }
 0x32c   : > { %767 = vrot.lane.b32.xlu0 %v721_v21, %s2550_s28 }
 0x32f   : > { %769 = vrot.lane.b32.xlu1 %v722_v26, %s2550_s28 }
 0x381   : > { %v744_v31 = vpop.permute.xlu1 %743 }
 0x382   : > { %v740_v28 = vpop.permute.xlu0 %739  ;;  %v789_v46 = vmul.f32 %v744_v31, %v2915_v12 }
 0x383   : > { %v787_v35 = vmul.f32 %v740_v28, %v2917_v4 }
 0x385   : > { %v742_v29 = vpop.permute.xlu1 %741 }
 0x386   : > { %v788_v25 = vmul.f32 %v742_v29, %v648_v22 }
 0x388   : > { %v811_v39 = vpack.c.bf16 %v788_v25, %v787_v35 }
 0x389   : > { %v746_v41 = vpop.permute.xlu1 %745 }
 0x38a   : > { %v790_v23 = vmul.f32 %v746_v41, %v656_v27  ;;  %2251 = vmatprep.mubr.msk.bf16.mxu0 %vm847_vm4, %v811_v39  ;;  %v748_v34 = vpop.permute.xlu0 %747 }
 0x38b   : > { %v791_v55 = vmul.f32 %v748_v34, %v661_v18 }
 0x38c   : > { %v812_v47 = vpack.c.bf16 %v790_v23, %v789_v46 }
 0x38d   : > { %v750_v48 = vpop.permute.xlu1 %749 }
 0x38e   : > { %v792_v56 = vmul.f32 %v750_v48, %v664_v45  ;;  %2252 = vmatmul.mubr.msk.bf16.vlgmr.msra.gmra.mrb[16].mxu0 %vm847_vm4, %v812_v47  ;;  %v752_v63 = vpop.permute.xlu0 %751 }
 0x38f   : > { %v793_v4 = vmul.f32 %v752_v63, %v2924_v24 }
 0x390   : > { %v813_v51 = vpack.c.bf16 %v792_v56, %v791_v55 }
 0x391   : > { %v754_v0 = vpop.permute.xlu1 %753 }
 0x392   : > { %v794_v22 = vmul.f32 %v754_v0, %v672_v44  ;;  %2255 = vmatprep.mubr.msk.bf16.mxu0 %vm847_vm4, %v813_v51  ;;  %v756_v59 = vpop.permute.xlu0 %755 }
 0x393   : > { %v795_v5 = vmul.f32 %v756_v59, %v677_v42 }
 0x394   : > { %v814_v12 = vpack.c.bf16 %v794_v22, %v793_v4 }
 0x395   : > { %v758_v27 = vpop.permute.xlu1 %757 }
 0x396   : > { %v796_v16 = vmul.f32 %v758_v27, %v680_v32  ;;  %2256 = vmatmul.mubr.msk.bf16.gmra.mrb[20].mxu0 %vm847_vm4, %v814_v12  ;;  %v760_v6 = vpop.permute.xlu0 %759 }
 0x397   : > { %v797_v7 = vmul.f32 %v760_v6, %v685_v52  ;;  %v821_v52 = vsub.s32 5, %v2651_v30 }
 0x398   : > { %v815_v18 = vpack.c.bf16 %v796_v16, %v795_v5 }
 0x399   : > { %v762_v45 = vpop.permute.xlu1 %761 }
 0x39a   : > { %v798_v15 = vmul.f32 %v762_v45, %v688_v60  ;;  %2259 = vmatprep.mubr.msk.bf16.mxu0 %vm847_vm4, %v815_v18  ;;  %v764_v11 = vpop.permute.xlu0 %763  ;;  %v2954_v60 = vrot.slane %v569_v57, %v821_v52 }
 0x39b   : > { %v799_v44 = vmul.f32 %v764_v11, %v693_v3 }
 0x39c   : > { %v816_v21 = vpack.c.bf16 %v798_v15, %v797_v7 }
 0x39d   : > { %v766_v24 = vpop.permute.xlu1 %765 }
 0x39e   : > { %v800_v26 = vmul.f32 %v766_v24, %v696_v19  ;;  %2260 = vmatmul.mubr.msk.bf16.gmra.mrb[24].mxu0 %vm847_vm4, %v816_v21  ;;  %v768_v31 = vpop.permute.xlu0 %767 }
 0x39f   : > { %v801_v32 = vmul.f32 %v768_v31, %v701_v8 }
 0x3a0   : > { %v817_v28 = vpack.c.bf16 %v800_v26, %v799_v44 }
 0x3a1   : > { %v770_v42 = vpop.permute.xlu1 %769 }
 0x3a2   : > { %v802_v29 = vmul.f32 %v770_v42, %v704_v20  ;;  %2263 = vmatprep.mubr.msk.bf16.mxu0 %vm847_vm4, %v817_v28 }
 0x3a4   : > { %v818_v35 = vpack.c.bf16 %v802_v29, %v801_v32 }
 0x3a6   : > { %2264 = vmatmul.mubr.msk.bf16.gmra.mrb[28].mxu0 %vm847_vm4, %v818_v35 }
 0x461   : > { %v2253_v3 = vpop.f32.mrb[16].mxu0 }
 0x462   : > { %v906_v19 = vpop.f32.mrb[17].mxu0  ;;  %v915_v25 = vadd.f32 %v2253_v3, %v2954_v60 }
 0x463   : > { %v907_v39 = vadd.f32 %v906_v19, %v2954_v60  ;;  %v2254_v41 = vpop.f32.mrb[18].mxu0 }
 0x464   : > { %v909_v8 = vpop.f32.mrb[19].mxu0  ;;  %v2963_v23 = vadd.f32 %v915_v25, %v2659_v36  ;;  %v918_v37 = vadd.f32 %v2254_v41, %v2954_v60 }
 0x465   : > { %v2959_v20 = vadd.f32 %v907_v39, %v2661_v38  ;;  %v910_v46 = vadd.f32 %v909_v8, %v2954_v60 }
 0x466   : > { %v2974_v55 = vadd.f32 %v918_v37, %v2663_v40 }
 0x467   : > { %v2967_v57 = vadd.f32 %v910_v46, %v2667_v43  ;;  %v985_v34 = vsel %vm304_vm3, %v2959_v20, 0.0  ;;  %v991_v43 = vsel %vm304_vm3, %v2963_v23, 0.0 }
 0x468   : > { %986 = vadd.xlane.f32.xlu0 %v985_v34  ;;  %v994_v59 = vsel %vm304_vm3, %v2974_v55, 0.0 }
 0x469   : > { %v2257_v47 = vpop.f32.mrb[20].mxu0  ;;  %v988_v48 = vsel %vm304_vm3, %v2967_v57, 0.0 }
 0x46a   : > { %989 = vadd.xlane.f32.xlu1 %v988_v48  ;;  %v922_v38 = vpop.f32.mrb[21].mxu0  ;;  %v931_v4 = vadd.f32 %v2257_v47, %v2954_v60 }
 0x46b   : > { %v923_v36 = vadd.f32 %v922_v38, %v2954_v60  ;;  %v2258_v56 = vpop.f32.mrb[22].mxu0 }
 0x46c   : > { %992 = vadd.xlane.f32.xlu0 %v991_v43  ;;  %v925_v63 = vpop.f32.mrb[23].mxu0  ;;  %v934_v51 = vadd.f32 %v2258_v56, %v2954_v60  ;;  %v2996_v6 = vadd.f32 %v931_v4, %v2675_v49 }
 0x46d   : > { %v926_v0 = vadd.f32 %v925_v63, %v2954_v60  ;;  %v2983_v22 = vadd.f32 %v923_v36, %v2677_v50 }
 0x46e   : > { %v2991_v12 = vadd.f32 %v934_v51, %v2679_v53  ;;  %v1003_v24 = vsel %vm304_vm3, %v2996_v6, 0.0 }
 0x46f   : > { %v2986_v40 = vadd.f32 %v926_v0, %v2681_v54  ;;  %v997_v18 = vsel %vm304_vm3, %v2983_v22, 0.0 }
 0x470   : > { %995 = vadd.xlane.f32.xlu0 %v994_v59  ;;  %v1006_v15 = vsel %vm304_vm3, %v2991_v12, 0.0 }
 0x471   : > { %v2261_v27 = vpop.f32.mrb[24].mxu0  ;;  %v1000_v5 = vsel %vm304_vm3, %v2986_v40, 0.0 }
 0x472   : > { %1001 = vadd.xlane.f32.xlu1 %v1000_v5  ;;  %v938_v16 = vpop.f32.mrb[25].mxu0  ;;  %v947_v11 = vadd.f32 %v2261_v27, %v2954_v60 }
 0x473   : > { %v939_v50 = vadd.f32 %v938_v16, %v2954_v60  ;;  %v2262_v54 = vpop.f32.mrb[26].mxu0 }
 0x474   : > { %998 = vadd.xlane.f32.xlu0 %v997_v18  ;;  %v941_v45 = vpop.f32.mrb[27].mxu0  ;;  %v950_v53 = vadd.f32 %v2262_v54, %v2954_v60  ;;  %v3020_v42 = vadd.f32 %v947_v11, %v2691_v61 }
 0x475   : > { %v942_v7 = vadd.f32 %v941_v45, %v2954_v60  ;;  %v3007_v49 = vadd.f32 %v939_v50, %v2693_v62 }
 0x476   : > { %1007 = vadd.xlane.f32.xlu1 %v1006_v15  ;;  %v3015_v44 = vadd.f32 %v950_v53, %v2695_v1  ;;  %v1015_v25 = vsel %vm304_vm3, %v3020_v42, 0.0 }
 0x477   : > { %v3010_v21 = vadd.f32 %v942_v7, %v2697_v2  ;;  %v1009_v32 = vsel %vm304_vm3, %v3007_v49, 0.0 }
 0x478   : > { %1004 = vadd.xlane.f32.xlu0 %v1003_v24  ;;  %v1018_v52 = vsel %vm304_vm3, %v3015_v44, 0.0 }
 0x479   : > { %v2265_v26 = vpop.f32.mrb[28].mxu0  ;;  %v1012_v31 = vsel %vm304_vm3, %v3010_v21, 0.0 }
 0x47a   : > { %1013 = vadd.xlane.f32.xlu1 %v1012_v31  ;;  %v954_v28 = vpop.f32.mrb[29].mxu0  ;;  %v963_v3 = vadd.f32 %v2265_v26, %v2954_v60 }
 0x47b   : > { %v955_v62 = vadd.f32 %v954_v28, %v2954_v60  ;;  %v2266_v2 = vpop.f32.mrb[30].mxu0 }
 0x47c   : > { %1010 = vadd.xlane.f32.xlu0 %v1009_v32  ;;  %v957_v29 = vpop.f32.mrb[31].mxu0  ;;  %v966_v1 = vadd.f32 %v2266_v2, %v2954_v60  ;;  %v3044_v8 = vadd.f32 %v963_v3, %v2707_v9 }
 0x47d   : > { %v958_v35 = vadd.f32 %v957_v29, %v2954_v60  ;;  %v3031_v61 = vadd.f32 %v955_v62, %v2709_v10 }
 0x47e   : > { %1019 = vadd.xlane.f32.xlu1 %v1018_v52  ;;  %v3039_v39 = vadd.f32 %v966_v1, %v2711_v13  ;;  %v1027_v60 = vsel %vm304_vm3, %v3044_v8, 0.0  ;;  %v2382_v13 = vld [vmem:[%s3605_s1 + $0x18] sm:$0xff]  }
 0x47f   : > { %v3034_v19 = vadd.f32 %v958_v35, %v2713_v14  ;;  %v1021_v10 = vsel %vm304_vm3, %v3031_v61, 0.0  ;;  %2267 = vmatprep.subr.bf16.mxu1 %v2382_v13 }
 0x480   : > { %1016 = vadd.xlane.f32.xlu0 %v1015_v25  ;;  %v1030_v14 = vsel %vm304_vm3, %v3039_v39, 0.0  ;;  %2268 = vmatpush3.bf16.msra.mxu1 %v2382_v13 }
 0x481   : > { %v1024_v41 = vsel %vm304_vm3, %v3034_v19, 0.0 }
 0x482   : > { %1025 = vadd.xlane.f32.xlu1 %v1024_v41 }
 0x484   : > { %1022 = vadd.xlane.f32.xlu0 %v1021_v10 }
 0x486   : > { %1031 = vadd.xlane.f32.xlu1 %v1030_v14 }
 0x488   : > { %1028 = vadd.xlane.f32.xlu0 %v1027_v60 }
 0x4f5   : > { %v987_v9 = vpop.xlane.xlu0 %986 }
 0x4f6   : > { %v1033_v46 = vmul.f32 0.03125, %v987_v9 }
 0x4f7   : > { %v990_v37 = vpop.xlane.xlu1 %989 }
 0x4f8   : > { %v3056_v34 = vsub.f32 %v2959_v20, %v1033_v46  ;;  %v1034_v47 = vmul.f32 0.03125, %v990_v37 }
 0x4f9   : > { %v993_v48 = vpop.xlane.xlu0 %992 }
 0x4fa   : > { %v3059_v38 = vsub.f32 %v2967_v57, %v1034_v47  ;;  %v1035_v36 = vmul.f32 0.03125, %v993_v48  ;;  %v1065_v56 = vmul.f32 %v3056_v34, %v3056_v34 }
 0x4fc   : > { %v3064_v43 = vsub.f32 %v2963_v23, %v1035_v36  ;;  %v1081_v63 = vsel %vm304_vm3, %v1065_v56, 0.0  ;;  %v1066_v51 = vmul.f32 %v3059_v38, %v3059_v38 }
 0x4fd   : > { %1082 = vadd.xlane.f32.xlu0 %v1081_v63  ;;  %v996_v0 = vpop.xlane.xlu0 %995 }
 0x4fe   : > { %v1036_v4 = vmul.f32 0.03125, %v996_v0  ;;  %v1084_v59 = vsel %vm304_vm3, %v1066_v51, 0.0  ;;  %v1067_v27 = vmul.f32 %v3064_v43, %v3064_v43 }
 0x4ff   : > { %v1002_v5 = vpop.xlane.xlu1 %1001  ;;  %1085 = vadd.xlane.f32.xlu1 %v1084_v59 }
 0x500   : > { %v3073_v16 = vsub.f32 %v2974_v55, %v1036_v4  ;;  %v1038_v50 = vmul.f32 0.03125, %v1002_v5  ;;  %v1087_v54 = vsel %vm304_vm3, %v1067_v27, 0.0 }
 0x501   : > { %1088 = vadd.xlane.f32.xlu0 %v1087_v54  ;;  %v999_v18 = vpop.xlane.xlu0 %998 }
 0x502   : > { %v3077_v45 = vsub.f32 %v2986_v40, %v1038_v50  ;;  %v1037_v53 = vmul.f32 0.03125, %v999_v18  ;;  %v1068_v7 = vmul.f32 %v3073_v16, %v3073_v16 }
 0x503   : > { %v1008_v15 = vpop.xlane.xlu1 %1007 }
 0x504   : > { %v3082_v11 = vsub.f32 %v2983_v22, %v1037_v53  ;;  %v1040_v24 = vmul.f32 0.03125, %v1008_v15  ;;  %v1090_v26 = vsel %vm304_vm3, %v1068_v7, 0.0  ;;  %v1070_v31 = vmul.f32 %v3077_v45, %v3077_v45 }
 0x505   : > { %1091 = vadd.xlane.f32.xlu1 %v1090_v26  ;;  %v1005_v28 = vpop.xlane.xlu0 %1004 }
 0x506   : > { %v3088_v62 = vsub.f32 %v2991_v12, %v1040_v24  ;;  %v1039_v2 = vmul.f32 0.03125, %v1005_v28  ;;  %v1069_v32 = vmul.f32 %v3082_v11, %v3082_v11  ;;  %v1096_v1 = vsel %vm304_vm3, %v1070_v31, 0.0 }
 0x507   : > { %v1014_v29 = vpop.xlane.xlu1 %1013 }
 0x508   : > { %v3094_v35 = vsub.f32 %v2996_v6, %v1039_v2  ;;  %v1042_v52 = vmul.f32 0.03125, %v1014_v29  ;;  %v1093_v3 = vsel %vm304_vm3, %v1069_v32, 0.0  ;;  %v1072_v25 = vmul.f32 %v3088_v62, %v3088_v62 }
 0x509   : > { %1097 = vadd.xlane.f32.xlu1 %v1096_v1  ;;  %1094 = vadd.xlane.f32.xlu0 %v1093_v3  ;;  %v1011_v41 = vpop.xlane.xlu0 %1010 }
 0x50a   : > { %v3100_v10 = vsub.f32 %v3010_v21, %v1042_v52  ;;  %v1041_v14 = vmul.f32 0.03125, %v1011_v41  ;;  %v1071_v60 = vmul.f32 %v3094_v35, %v3094_v35  ;;  %v1102_v9 = vsel %vm304_vm3, %v1072_v25, 0.0 }
 0x50b   : > { %v1020_v13 = vpop.xlane.xlu1 %1019 }
 0x50c   : > { %v3106_v46 = vsub.f32 %v3007_v49, %v1041_v14  ;;  %v1044_v37 = vmul.f32 0.03125, %v1020_v13  ;;  %v1099_v47 = vsel %vm304_vm3, %v1071_v60, 0.0  ;;  %v1074_v48 = vmul.f32 %v3100_v10, %v3100_v10 }
 0x50d   : > { %1103 = vadd.xlane.f32.xlu1 %v1102_v9  ;;  %1100 = vadd.xlane.f32.xlu0 %v1099_v47  ;;  %v1017_v36 = vpop.xlane.xlu0 %1016 }
 0x50e   : > { %v3112_v56 = vsub.f32 %v3015_v44, %v1044_v37  ;;  %v1043_v63 = vmul.f32 0.03125, %v1017_v36  ;;  %v1073_v51 = vmul.f32 %v3106_v46, %v3106_v46  ;;  %v1108_v4 = vsel %vm304_vm3, %v1074_v48, 0.0  ;;  %v2383_v37 = vld [vmem:[%s3605_s1 + $0x20] sm:$0xff]  }
 0x50f   : > { %v1026_v0 = vpop.xlane.xlu1 %1025  ;;  %2269 = vmatprep.subr.bf16.mxu1 %v2383_v37 }
 0x510   : > { %v3118_v59 = vsub.f32 %v3020_v42, %v1043_v63  ;;  %v1046_v27 = vmul.f32 0.03125, %v1026_v0  ;;  %v1105_v5 = vsel %vm304_vm3, %v1073_v51, 0.0  ;;  %v1076_v50 = vmul.f32 %v3112_v56, %v3112_v56  ;;  %2270 = vmatpush3.bf16.msra.mxu1 %v2383_v37 }
 0x511   : > { %1109 = vadd.xlane.f32.xlu1 %v1108_v4  ;;  %1106 = vadd.xlane.f32.xlu0 %v1105_v5  ;;  %v1023_v54 = vpop.xlane.xlu0 %1022  ;;  %v1193_v5 = vld [vmem:[%s3605_s1 + $0x68] sm:$0x8] }
 0x512   : > { %v3124_v18 = vsub.f32 %v3034_v19, %v1046_v27  ;;  %v1045_v53 = vmul.f32 0.03125, %v1023_v54  ;;  %v1075_v7 = vmul.f32 %v3118_v59, %v3118_v59  ;;  %v1114_v24 = vsel %vm304_vm3, %v1076_v50, 0.0 }
 0x513   : > { %v1032_v15 = vpop.xlane.xlu1 %1031 }
 0x514   : > { %v3130_v26 = vsub.f32 %v3031_v61, %v1045_v53  ;;  %v1048_v31 = vmul.f32 0.03125, %v1032_v15  ;;  %v1111_v28 = vsel %vm304_vm3, %v1075_v7, 0.0  ;;  %v1078_v2 = vmul.f32 %v3124_v18, %v3124_v18 }
 0x515   : > { %1115 = vadd.xlane.f32.xlu1 %v1114_v24  ;;  %1112 = vadd.xlane.f32.xlu0 %v1111_v28  ;;  %v1029_v32 = vpop.xlane.xlu0 %1028  ;;  %v1194_v7 = vunpack.c.l.bf16 %v1193_v5  ;;  %v1197_v15 = vsub.s32 6, %v2651_v30 }
 0x516   : > { %v3136_v29 = vsub.f32 %v3039_v39, %v1048_v31  ;;  %v1047_v1 = vmul.f32 0.03125, %v1029_v32  ;;  %v1077_v52 = vmul.f32 %v3130_v26, %v3130_v26  ;;  %v1120_v25 = vsel %vm304_vm3, %v1078_v2, 0.0 }
 0x518   : > { %v3141_v3 = vsub.f32 %v3044_v8, %v1047_v1  ;;  %v1117_v41 = vsel %vm304_vm3, %v1077_v52, 0.0  ;;  %v1080_v14 = vmul.f32 %v3136_v29, %v3136_v29  ;;  %v3158_v1 = vrot.slane %v1194_v7, %v1197_v15 }
 0x519   : > { %1121 = vadd.xlane.f32.xlu1 %v1120_v25  ;;  %1118 = vadd.xlane.f32.xlu0 %v1117_v41  ;;  %v1217_v52 = vsub.s32 7, %v2651_v30 }
 0x51a   : > { %v1079_v60 = vmul.f32 %v3141_v3, %v3141_v3  ;;  %v1126_v13 = vsel %vm304_vm3, %v1080_v14, 0.0 }
 0x51c   : > { %v1123_v9 = vsel %vm304_vm3, %v1079_v60, 0.0 }
 0x51d   : > { %1127 = vadd.xlane.f32.xlu1 %v1126_v13  ;;  %1124 = vadd.xlane.f32.xlu0 %v1123_v9 }
 0x58a   : > { %v1083_v47 = vpop.xlane.xlu0 %1082 }
 0x58b   : > { %v1129_v48 = vmul.f32 0.03125, %v1083_v47 }
 0x58c   : > { %v1086_v36 = vpop.xlane.xlu1 %1085 }
 0x58d   : > { %v1145_v63 = vadd.f32 1e-05, %v1129_v48  ;;  %v1130_v51 = vmul.f32 0.03125, %v1086_v36 }
 0x58e   : > { %v1089_v0 = vpop.xlane.xlu0 %1088 }
 0x58f   : > { %2420 = vrsqrt.f32 %v1145_v63  ;;  %v1146_v4 = vadd.f32 1e-05, %v1130_v51  ;;  %v1131_v27 = vmul.f32 0.03125, %v1089_v0  ;;  %v3163_v63 = vrot.slane %v1194_v7, %v1217_v52 }
 0x591   : > { %2422 = vrsqrt.f32 %v1146_v4  ;;  %v1147_v50 = vadd.f32 1e-05, %v1131_v27 }
 0x592   : > { %v1092_v54 = vpop.xlane.xlu1 %1091 }
 0x593   : > { %2424 = vrsqrt.f32 %v1147_v50  ;;  %v1132_v53 = vmul.f32 0.03125, %v1092_v54 }
 0x595   : > { %v1148_v24 = vadd.f32 1e-05, %v1132_v53 }
 0x596   : > { %v1098_v31 = vpop.xlane.xlu1 %1097  ;;  %v1095_v28 = vpop.xlane.xlu0 %1094 }
 0x597   : > { %2426 = vrsqrt.f32 %v1148_v24  ;;  %v1134_v2 = vmul.f32 0.03125, %v1098_v31  ;;  %v1133_v32 = vmul.f32 0.03125, %v1095_v28 }
 0x599   : > { %v2421_v25 = vpop.eup %2420  ;;  %v1150_v41 = vadd.f32 1e-05, %v1134_v2  ;;  %v1149_v14 = vadd.f32 1e-05, %v1133_v32 }
 0x59a   : > { %v1177_v60 = vmul.f32 %v2421_v25, %v3056_v34  ;;  %v1104_v13 = vpop.xlane.xlu1 %1103  ;;  %v1101_v9 = vpop.xlane.xlu0 %1100 }
 0x59b   : > { %v2423_v37 = vpop.eup %2422  ;;  %2428 = vrsqrt.f32 %v1150_v41  ;;  %v1136_v47 = vmul.f32 0.03125, %v1104_v13  ;;  %v1135_v48 = vmul.f32 0.03125, %v1101_v9 }
 0x59c   : > { %v1178_v36 = vmul.f32 %v2423_v37, %v3059_v38  ;;  %2430 = vrsqrt.f32 %v1149_v14  ;;  %v1199_v51 = vmul.f32 %v3158_v1, %v1177_v60 }
 0x59d   : > { %v2425_v0 = vpop.eup %2424  ;;  %v1152_v4 = vadd.f32 1e-05, %v1136_v47  ;;  %v1151_v27 = vadd.f32 1e-05, %v1135_v48 }
 0x59e   : > { %v1179_v5 = vmul.f32 %v2425_v0, %v3064_v43  ;;  %v1110_v50 = vpop.xlane.xlu1 %1109  ;;  %v1107_v34 = vpop.xlane.xlu0 %1106  ;;  %v1200_v54 = vmul.f32 %v3158_v1, %v1178_v36  ;;  %v1219_v38 = vadd.f32 %v3163_v63, %v1199_v51 }
 0x59f   : > { %2432 = vrsqrt.f32 %v1152_v4  ;;  %v1138_v53 = vmul.f32 0.03125, %v1110_v50  ;;  %v1137_v15 = vmul.f32 0.03125, %v1107_v34 }
 0x5a0   : > { %2434 = vrsqrt.f32 %v1151_v27  ;;  %v1220_v7 = vadd.f32 %v3163_v63, %v1200_v54  ;;  %v1201_v2 = vmul.f32 %v3158_v1, %v1179_v5 }
 0x5a1   : > { %v2427_v24 = vpop.eup %2426  ;;  %v1154_v31 = vadd.f32 1e-05, %v1138_v53  ;;  %v1153_v28 = vadd.f32 1e-05, %v1137_v15 }
 0x5a2   : > { %v1180_v32 = vmul.f32 %v2427_v24, %v3073_v16  ;;  %v1116_v43 = vpop.xlane.xlu1 %1115  ;;  %v1113_v52 = vpop.xlane.xlu0 %1112  ;;  %v1239_v25 = vpack.c.bf16 %v1220_v7, %v1219_v38  ;;  %v1221_v48 = vadd.f32 %v3163_v63, %v1201_v2 }
 0x5a3   : > { %2436 = vrsqrt.f32 %v1154_v31  ;;  %v1140_v41 = vmul.f32 0.03125, %v1116_v43  ;;  %v1139_v14 = vmul.f32 0.03125, %v1113_v52 }
 0x5a4   : > { %v1202_v60 = vmul.f32 %v3158_v1, %v1180_v32  ;;  %2438 = vrsqrt.f32 %v1153_v28  ;;  %2271 = vmatprep.mubr.msk.bf16.mxu1 %vm304_vm3, %v1239_v25 }
 0x5a5   : > { %v2429_v13 = vpop.eup %2428  ;;  %v1156_v9 = vadd.f32 1e-05, %v1140_v41  ;;  %v1155_v37 = vadd.f32 1e-05, %v1139_v14 }
 0x5a6   : > { %v2431_v47 = vpop.eup %2430  ;;  %v1222_v36 = vadd.f32 %v3163_v63, %v1202_v60  ;;  %v1182_v16 = vmul.f32 %v2429_v13, %v3077_v45  ;;  %v1122_v51 = vpop.xlane.xlu1 %1121 }
 0x5a7   : > { %v1119_v0 = vpop.xlane.xlu0 %1118  ;;  %v1181_v4 = vmul.f32 %v2431_v47, %v3082_v11  ;;  %2440 = vrsqrt.f32 %v1156_v9  ;;  %v1142_v27 = vmul.f32 0.03125, %v1122_v51 }
 0x5a8   : > { %v1141_v5 = vmul.f32 0.03125, %v1119_v0  ;;  %2442 = vrsqrt.f32 %v1155_v37  ;;  %v1240_v50 = vpack.c.bf16 %v1222_v36, %v1221_v48  ;;  %v1204_v34 = vmul.f32 %v3158_v1, %v1182_v16 }
 0x5a9   : > { %v2433_v54 = vpop.eup %2432  ;;  %v1158_v53 = vadd.f32 1e-05, %v1142_v27  ;;  %v1203_v38 = vmul.f32 %v3158_v1, %v1181_v4 }
 0x5aa   : > { %v1157_v15 = vadd.f32 1e-05, %v1141_v5  ;;  %v2435_v7 = vpop.eup %2434  ;;  %v1184_v24 = vmul.f32 %v2433_v54, %v3088_v62  ;;  %v1128_v45 = vpop.xlane.xlu1 %1127  ;;  %2272 = vmatmul.mubr.msk.bf16.vlgmr.msra.gmra.mrb[16].mxu1 %vm304_vm3, %v1240_v50  ;;  %v1224_v11 = vadd.f32 %v3163_v63, %v1204_v34 }
 0x5ab   : > { %v1125_v31 = vpop.xlane.xlu0 %1124  ;;  %v1183_v28 = vmul.f32 %v2435_v7, %v3094_v35  ;;  %2444 = vrsqrt.f32 %v1158_v53  ;;  %v1144_v2 = vmul.f32 0.03125, %v1128_v45  ;;  %v1223_v43 = vadd.f32 %v3163_v63, %v1203_v38 }
 0x5ac   : > { %v1143_v32 = vmul.f32 0.03125, %v1125_v31  ;;  %2446 = vrsqrt.f32 %v1157_v15  ;;  %v1206_v52 = vmul.f32 %v3158_v1, %v1184_v24 }
 0x5ad   : > { %v2437_v25 = vpop.eup %2436  ;;  %v1160_v41 = vadd.f32 1e-05, %v1144_v2  ;;  %v1205_v62 = vmul.f32 %v3158_v1, %v1183_v28  ;;  %v1241_v9 = vpack.c.bf16 %v1224_v11, %v1223_v43 }
 0x5ae   : > { %v1159_v14 = vadd.f32 1e-05, %v1143_v32  ;;  %v2439_v60 = vpop.eup %2438  ;;  %v1186_v13 = vmul.f32 %v2437_v25, %v3100_v10  ;;  %v1226_v37 = vadd.f32 %v3163_v63, %v1206_v52 }
 0x5af   : > { %v1185_v35 = vmul.f32 %v2439_v60, %v3106_v46  ;;  %2448 = vrsqrt.f32 %v1160_v41  ;;  %v1225_v47 = vadd.f32 %v3163_v63, %v1205_v62  ;;  %2275 = vmatprep.mubr.msk.bf16.mxu1 %vm304_vm3, %v1241_v9  ;;  %v1251_v60 = vsub.s32 0, %v2651_v30 }
 0x5b0   : > { %2450 = vrsqrt.f32 %v1159_v14  ;;  %v1208_v48 = vmul.f32 %v3158_v1, %v1186_v13  ;;  %v2385_v14 = vld [vmem:[%s3605_s1 + $0x50] sm:$0xff]   ;;  %v2387_v13 = vld [vmem:[%s3605_s1 + $0x60] sm:$0xff]  }
 0x5b1   : > { %v2441_v36 = vpop.eup %2440  ;;  %v1242_v16 = vpack.c.bf16 %v1226_v37, %v1225_v47  ;;  %v1207_v51 = vmul.f32 %v3158_v1, %v1185_v35 }
 0x5b2   : > { %v2443_v0 = vpop.eup %2442  ;;  %v1188_v10 = vmul.f32 %v2441_v36, %v3112_v56  ;;  %v1228_v4 = vadd.f32 %v3163_v63, %v1208_v48 }
 0x5b3   : > { %v1187_v27 = vmul.f32 %v2443_v0, %v3118_v59  ;;  %2276 = vmatmul.mubr.msk.bf16.gmra.mrb[20].mxu1 %vm304_vm3, %v1242_v16  ;;  %v1227_v46 = vadd.f32 %v3163_v63, %v1207_v51 }
 0x5b4   : > { %v1210_v5 = vmul.f32 %v3158_v1, %v1188_v10 }
 0x5b5   : > { %v2445_v50 = vpop.eup %2444  ;;  %v1243_v34 = vpack.c.bf16 %v1228_v4, %v1227_v46  ;;  %v1209_v54 = vmul.f32 %v3158_v1, %v1187_v27 }
 0x5b6   : > { %v2447_v53 = vpop.eup %2446  ;;  %v1190_v15 = vmul.f32 %v2445_v50, %v3124_v18  ;;  %v1230_v38 = vadd.f32 %v3163_v63, %v1210_v5 }
 0x5b7   : > { %v1189_v56 = vmul.f32 %v2447_v53, %v3130_v26  ;;  %2279 = vmatprep.mubr.msk.bf16.mxu1 %vm304_vm3, %v1243_v34  ;;  %v1229_v59 = vadd.f32 %v3163_v63, %v1209_v54 }
 0x5b8   : > { %v1212_v7 = vmul.f32 %v3158_v1, %v1190_v15 }
 0x5b9   : > { %v2449_v24 = vpop.eup %2448  ;;  %v1244_v45 = vpack.c.bf16 %v1230_v38, %v1229_v59  ;;  %v1211_v31 = vmul.f32 %v3158_v1, %v1189_v56 }
 0x5ba   : > { %v2451_v11 = vpop.eup %2450  ;;  %v1192_v28 = vmul.f32 %v2449_v24, %v3136_v29  ;;  %v1232_v2 = vadd.f32 %v3163_v63, %v1212_v7 }
 0x5bb   : > { %v1191_v18 = vmul.f32 %v2451_v11, %v3141_v3  ;;  %2280 = vmatmul.mubr.msk.bf16.gmra.mrb[24].mxu1 %vm304_vm3, %v1244_v45  ;;  %v1231_v26 = vadd.f32 %v3163_v63, %v1211_v31  ;;  %v2384_v3 = vld [vmem:[%s3605_s1 + $0x48] sm:$0xff]  }
 0x5bc   : > { %v1214_v32 = vmul.f32 %v3158_v1, %v1192_v28  ;;  %2287 = vmatprep.subr.bf16.mxu0 %v2384_v3 }
 0x5bd   : > { %v1245_v43 = vpack.c.bf16 %v1232_v2, %v1231_v26  ;;  %v1213_v52 = vmul.f32 %v3158_v1, %v1191_v18  ;;  %2288 = vmatpush3.bf16.msra.mxu0 %v2384_v3  ;;  %v2386_v1 = vld [vmem:[%s3605_s1 + $0x58] sm:$0xff]  }
 0x5be   : > { %v1234_v25 = vadd.f32 %v3163_v63, %v1214_v32  ;;  %2289 = vmatprep.subr.bf16.mxu0 %v2385_v14 }
 0x5bf   : > { %2283 = vmatprep.mubr.msk.bf16.mxu1 %vm304_vm3, %v1245_v43  ;;  %v1233_v41 = vadd.f32 %v3163_v63, %v1213_v52  ;;  %v3231_v63 = vld [vmem:[%s3605_s1 + $0x6c] sm:$0x1] }
 0x5c0   : > { %v1248_v62 = vunpack.c.l.bf16 %v3231_v63 }
 0x5c1   : > { %v1246_v29 = vpack.c.bf16 %v1234_v25, %v1233_v41  ;;  %2290 = vmatpush3.bf16.msra.mxu0 %v2385_v14 }
 0x5c2   : > { %2291 = vmatprep.subr.bf16.mxu0 %v2386_v1  ;;  %v1252_v9 = vrot.slane %v1248_v62, %v1251_v60 }
 0x5c3   : > { %2284 = vmatmul.mubr.msk.bf16.gmra.mrb[28].mxu1 %vm304_vm3, %v1246_v29 }
 0x5c5   : > { %2292 = vmatpush3.bf16.msra.mxu0 %v2386_v1 }
 0x5c6   : > { %2293 = vmatprep.subr.bf16.mxu0 %v2387_v13 }
 0x5c9   : > { %2294 = vmatpush3.bf16.msra.mxu0 %v2387_v13 }
 0x67d   : > { %v2273_v37 = vpop.f32.mrb[16].mxu1 }
 0x67e   : > { %v3240_v35 = vadd.f32 %v2273_v37, %v1252_v9  ;;  %v1323_v47 = vpop.f32.mrb[17].mxu1 }
 0x67f   : > { %v3242_v48 = vadd.f32 %v1323_v47, %v1252_v9  ;;  %v2274_v36 = vpop.f32.mrb[18].mxu1 }
 0x680   : > { %v1388_v16 = vmax.f32 %v3240_v35, 0.0  ;;  %v1326_v51 = vpop.f32.mrb[19].mxu1  ;;  %v1335_v27 = vadd.f32 %v2274_v36, %v1252_v9 }
 0x681   : > { %v1386_v0 = vmax.f32 %v3242_v48, 0.0  ;;  %v1327_v10 = vadd.f32 %v1326_v51, %v1252_v9 }
 0x682   : > { %1422 = vrot.lane.b32.xlu1 %v1388_v16, %s2550_s28  ;;  %v1389_v50 = vmax.f32 %v1335_v27, 0.0 }
 0x683   : > { %v1387_v4 = vmax.f32 %v1327_v10, 0.0  ;;  %1418 = vrot.lane.b32.xlu0 %v1386_v0, %s2550_s28 }
 0x686   : > { %v2277_v46 = vpop.f32.mrb[20].mxu1  ;;  %1420 = vrot.lane.b32.xlu1 %v1387_v4, %s2550_s28 }
 0x687   : > { %v1339_v5 = vpop.f32.mrb[21].mxu1  ;;  %v3249_v15 = vadd.f32 %v2277_v46, %v1252_v9 }
 0x688   : > { %v1340_v34 = vadd.f32 %v1339_v5, %v1252_v9  ;;  %v2278_v54 = vpop.f32.mrb[22].mxu1 }
 0x689   : > { %v1342_v53 = vpop.f32.mrb[23].mxu1  ;;  %v1351_v59 = vadd.f32 %v2278_v54, %v1252_v9  ;;  %v1392_v24 = vmax.f32 %v3249_v15, 0.0 }
 0x68a   : > { %v1390_v38 = vmax.f32 %v1340_v34, 0.0  ;;  %v1343_v56 = vadd.f32 %v1342_v53, %v1252_v9  ;;  %1424 = vrot.lane.b32.xlu1 %v1389_v50, %s2550_s28 }
 0x68b   : > { %v1393_v11 = vmax.f32 %v1351_v59, 0.0 }
 0x68c   : > { %v1391_v7 = vmax.f32 %v1343_v56, 0.0  ;;  %1426 = vrot.lane.b32.xlu0 %v1390_v38, %s2550_s28 }
 0x68e   : > { %v2281_v45 = vpop.f32.mrb[24].mxu1  ;;  %1428 = vrot.lane.b32.xlu1 %v1391_v7, %s2550_s28 }
 0x68f   : > { %v1355_v31 = vpop.f32.mrb[25].mxu1  ;;  %v1364_v26 = vadd.f32 %v2281_v45, %v1252_v9 }
 0x690   : > { %v1356_v28 = vadd.f32 %v1355_v31, %v1252_v9  ;;  %1430 = vrot.lane.b32.xlu0 %v1392_v24, %s2550_s28  ;;  %v2282_v2 = vpop.f32.mrb[26].mxu1 }
 0x691   : > { %v1358_v18 = vpop.f32.mrb[27].mxu1  ;;  %v1367_v52 = vadd.f32 %v2282_v2, %v1252_v9  ;;  %v1396_v41 = vmax.f32 %v1364_v26, 0.0 }
 0x692   : > { %v1394_v32 = vmax.f32 %v1356_v28, 0.0  ;;  %v1359_v43 = vadd.f32 %v1358_v18, %v1252_v9  ;;  %1432 = vrot.lane.b32.xlu1 %v1393_v11, %s2550_s28 }
 0x693   : > { %v1397_v14 = vmax.f32 %v1367_v52, 0.0 }
 0x694   : > { %v1395_v25 = vmax.f32 %v1359_v43, 0.0  ;;  %1434 = vrot.lane.b32.xlu0 %v1394_v32, %s2550_s28 }
 0x696   : > { %v2285_v29 = vpop.f32.mrb[28].mxu1  ;;  %1436 = vrot.lane.b32.xlu1 %v1395_v25, %s2550_s28 }
 0x697   : > { %v1371_v3 = vpop.f32.mrb[29].mxu1  ;;  %v1380_v37 = vadd.f32 %v2285_v29, %v1252_v9 }
 0x698   : > { %v1372_v1 = vadd.f32 %v1371_v3, %v1252_v9  ;;  %1438 = vrot.lane.b32.xlu0 %v1396_v41, %s2550_s28  ;;  %v2286_v60 = vpop.f32.mrb[30].mxu1 }
 0x699   : > { %v1374_v13 = vpop.f32.mrb[31].mxu1  ;;  %v1383_v16 = vadd.f32 %v2286_v60, %v1252_v9  ;;  %v1400_v0 = vmax.f32 %v1380_v37, 0.0 }
 0x69a   : > { %v1398_v47 = vmax.f32 %v1372_v1, 0.0  ;;  %v1375_v36 = vadd.f32 %v1374_v13, %v1252_v9  ;;  %1440 = vrot.lane.b32.xlu1 %v1397_v14, %s2550_s28 }
 0x69b   : > { %v1401_v4 = vmax.f32 %v1383_v16, 0.0 }
 0x69c   : > { %v1399_v51 = vmax.f32 %v1375_v36, 0.0  ;;  %1442 = vrot.lane.b32.xlu0 %v1398_v47, %s2550_s28 }
 0x69e   : > { %1444 = vrot.lane.b32.xlu1 %v1399_v51, %s2550_s28 }
 0x6a0   : > { %1446 = vrot.lane.b32.xlu0 %v1400_v0, %s2550_s28 }
 0x6a2   : > { %1448 = vrot.lane.b32.xlu1 %v1401_v4, %s2550_s28 }
 0x6f4   : > { %v1423_v46 = vpop.permute.xlu1 %1422 }
 0x6f5   : > { %v1419_v5 = vpop.permute.xlu0 %1418  ;;  %v1468_v9 = vmul.f32 %v1423_v46, %v3240_v35 }
 0x6f6   : > { %v1466_v54 = vmul.f32 %v1419_v5, %v3242_v48 }
 0x6f8   : > { %v1421_v50 = vpop.permute.xlu1 %1420 }
 0x6f9   : > { %v1467_v53 = vmul.f32 %v1421_v50, %v1327_v10 }
 0x6fb   : > { %v1490_v38 = vpack.c.bf16 %v1467_v53, %v1466_v54 }
 0x6fc   : > { %v1425_v7 = vpop.permute.xlu1 %1424 }
 0x6fd   : > { %v1469_v24 = vmul.f32 %v1425_v7, %v1335_v27  ;;  %2295 = vmatprep.mubr.msk.bf16.mxu0 %vm847_vm4, %v1490_v38 }
 0x6fe   : > { %v1427_v45 = vpop.permute.xlu0 %1426 }
 0x6ff   : > { %v1491_v31 = vpack.c.bf16 %v1469_v24, %v1468_v9  ;;  %v1470_v2 = vmul.f32 %v1427_v45, %v1340_v34 }
 0x700   : > { %v1429_v11 = vpop.permute.xlu1 %1428 }
 0x701   : > { %v1471_v18 = vmul.f32 %v1429_v11, %v1343_v56  ;;  %2296 = vmatmul.mubr.msk.bf16.vlgmr.msra.gmra.mrb[32].mxu0 %vm847_vm4, %v1491_v31 }
 0x702   : > { %v1431_v32 = vpop.permute.xlu0 %1430 }
 0x703   : > { %v1492_v25 = vpack.c.bf16 %v1471_v18, %v1470_v2  ;;  %v1472_v48 = vmul.f32 %v1431_v32, %v3249_v15 }
 0x704   : > { %v1433_v41 = vpop.permute.xlu1 %1432 }
 0x705   : > { %v1473_v10 = vmul.f32 %v1433_v41, %v1351_v59  ;;  %2299 = vmatprep.mubr.msk.bf16.mxu0 %vm847_vm4, %v1492_v25 }
 0x706   : > { %v1435_v29 = vpop.permute.xlu0 %1434 }
 0x707   : > { %v1493_v35 = vpack.c.bf16 %v1473_v10, %v1472_v48  ;;  %v1474_v3 = vmul.f32 %v1435_v29, %v1356_v28 }
 0x708   : > { %v1437_v27 = vpop.permute.xlu1 %1436 }
 0x709   : > { %v1475_v14 = vmul.f32 %v1437_v27, %v1359_v43  ;;  %2300 = vmatmul.mubr.msk.bf16.gmra.mrb[36].mxu0 %vm847_vm4, %v1493_v35 }
 0x70a   : > { %v1439_v60 = vpop.permute.xlu0 %1438 }
 0x70b   : > { %v1494_v34 = vpack.c.bf16 %v1475_v14, %v1474_v3  ;;  %v1476_v13 = vmul.f32 %v1439_v60, %v1364_v26  ;;  %v3280_v26 = vrot.slane %v1248_v62, %v173_v33 }
 0x70c   : > { %v1441_v56 = vpop.permute.xlu1 %1440 }
 0x70d   : > { %v1477_v47 = vmul.f32 %v1441_v56, %v1367_v52  ;;  %2303 = vmatprep.mubr.msk.bf16.mxu0 %vm847_vm4, %v1494_v34 }
 0x70e   : > { %v1443_v51 = vpop.permute.xlu0 %1442 }
 0x70f   : > { %v1495_v0 = vpack.c.bf16 %v1477_v47, %v1476_v13  ;;  %v1478_v59 = vmul.f32 %v1443_v51, %v1372_v1 }
 0x710   : > { %v1445_v15 = vpop.permute.xlu1 %1444 }
 0x711   : > { %v1479_v4 = vmul.f32 %v1445_v15, %v1375_v36  ;;  %2304 = vmatmul.mubr.msk.bf16.gmra.mrb[40].mxu0 %vm847_vm4, %v1495_v0 }
 0x712   : > { %v1447_v46 = vpop.permute.xlu0 %1446 }
 0x713   : > { %v1496_v5 = vpack.c.bf16 %v1479_v4, %v1478_v59  ;;  %v1480_v43 = vmul.f32 %v1447_v46, %v1380_v37 }
 0x714   : > { %v1449_v28 = vpop.permute.xlu1 %1448 }
 0x715   : > { %v1481_v50 = vmul.f32 %v1449_v28, %v1383_v16  ;;  %2307 = vmatprep.mubr.msk.bf16.mxu0 %vm847_vm4, %v1496_v5 }
 0x717   : > { %v1497_v54 = vpack.c.bf16 %v1481_v50, %v1480_v43 }
 0x719   : > { %2308 = vmatmul.mubr.msk.bf16.gmra.mrb[44].mxu0 %vm847_vm4, %v1497_v54 }
 0x7d4   : > { %v2297_v52 = vpop.f32.mrb[32].mxu0 }
 0x7d5   : > { %v1584_v1 = vpop.f32.mrb[33].mxu0  ;;  %v1593_v36 = vadd.f32 %v2297_v52, %v3280_v26 }
 0x7d6   : > { %v1585_v53 = vadd.f32 %v1584_v1, %v3280_v26  ;;  %v2298_v38 = vpop.f32.mrb[34].mxu0 }
 0x7d7   : > { %v1587_v37 = vpop.f32.mrb[35].mxu0  ;;  %v1596_v9 = vadd.f32 %v2298_v38, %v3280_v26  ;;  %v3295_v63 = vadd.f32 %v1593_v36, %v2963_v23 }
 0x7d8   : > { %v1588_v16 = vadd.f32 %v1587_v37, %v3280_v26  ;;  %v3286_v7 = vadd.f32 %v1585_v53, %v2959_v20 }
 0x7d9   : > { %v3300_v20 = vadd.f32 %v1596_v9, %v2974_v55  ;;  %v1669_v2 = vsel %vm304_vm3, %v3295_v63, 0.0 }
 0x7da   : > { %v3290_v24 = vadd.f32 %v1588_v16, %v2967_v57  ;;  %v1663_v33 = vsel %vm304_vm3, %v3286_v7, 0.0 }
 0x7db   : > { %1664 = vadd.xlane.f32.xlu0 %v1663_v33  ;;  %v1672_v48 = vsel %vm304_vm3, %v3300_v20, 0.0 }
 0x7dc   : > { %v2301_v62 = vpop.f32.mrb[36].mxu0  ;;  %v1666_v45 = vsel %vm304_vm3, %v3290_v24, 0.0 }
 0x7dd   : > { %1667 = vadd.xlane.f32.xlu1 %v1666_v45  ;;  %v1600_v31 = vpop.f32.mrb[37].mxu0  ;;  %v1609_v25 = vadd.f32 %v2301_v62, %v3280_v26 }
 0x7de   : > { %v1601_v11 = vadd.f32 %v1600_v31, %v3280_v26  ;;  %v2302_v57 = vpop.f32.mrb[38].mxu0 }
 0x7df   : > { %1670 = vadd.xlane.f32.xlu0 %v1669_v2  ;;  %v1603_v18 = vpop.f32.mrb[39].mxu0  ;;  %v1612_v23 = vadd.f32 %v2302_v57, %v3280_v26  ;;  %v3322_v3 = vadd.f32 %v1609_v25, %v2996_v6 }
 0x7e0   : > { %v1604_v32 = vadd.f32 %v1603_v18, %v3280_v26  ;;  %v3309_v41 = vadd.f32 %v1601_v11, %v2983_v22 }
 0x7e1   : > { %v3317_v10 = vadd.f32 %v1612_v23, %v2991_v12  ;;  %v1681_v51 = vsel %vm304_vm3, %v3322_v3, 0.0 }
 0x7e2   : > { %v3312_v55 = vadd.f32 %v1604_v32, %v2986_v40  ;;  %v1675_v14 = vsel %vm304_vm3, %v3309_v41, 0.0 }
 0x7e3   : > { %1673 = vadd.xlane.f32.xlu0 %v1672_v48  ;;  %v1684_v56 = vsel %vm304_vm3, %v3317_v10, 0.0 }
 0x7e4   : > { %v2305_v29 = vpop.f32.mrb[40].mxu0  ;;  %v1678_v35 = vsel %vm304_vm3, %v3312_v55, 0.0 }
 0x7e5   : > { %1679 = vadd.xlane.f32.xlu1 %v1678_v35  ;;  %v1616_v27 = vpop.f32.mrb[41].mxu0  ;;  %v1625_v13 = vadd.f32 %v2305_v29, %v3280_v26 }
 0x7e6   : > { %v1617_v22 = vadd.f32 %v1616_v27, %v3280_v26  ;;  %v2306_v40 = vpop.f32.mrb[42].mxu0 }
 0x7e7   : > { %1676 = vadd.xlane.f32.xlu0 %v1675_v14  ;;  %v1619_v60 = vpop.f32.mrb[43].mxu0  ;;  %v1628_v12 = vadd.f32 %v2306_v40, %v3280_v26  ;;  %v3346_v46 = vadd.f32 %v1625_v13, %v3020_v42 }
 0x7e8   : > { %v1620_v34 = vadd.f32 %v1619_v60, %v3280_v26  ;;  %v3333_v6 = vadd.f32 %v1617_v22, %v3007_v49 }
 0x7e9   : > { %1685 = vadd.xlane.f32.xlu1 %v1684_v56  ;;  %v3341_v0 = vadd.f32 %v1628_v12, %v3015_v44  ;;  %v1693_v1 = vsel %vm304_vm3, %v3346_v46, 0.0 }
 0x7ea   : > { %v3336_v47 = vadd.f32 %v1620_v34, %v3010_v21  ;;  %v1687_v5 = vsel %vm304_vm3, %v3333_v6, 0.0 }
 0x7eb   : > { %1682 = vadd.xlane.f32.xlu0 %v1681_v51  ;;  %v1696_v50 = vsel %vm304_vm3, %v3341_v0, 0.0 }
 0x7ec   : > { %v2309_v15 = vpop.f32.mrb[44].mxu0  ;;  %v1690_v59 = vsel %vm304_vm3, %v3336_v47, 0.0 }
 0x7ed   : > { %1691 = vadd.xlane.f32.xlu1 %v1690_v59  ;;  %v1632_v4 = vpop.f32.mrb[45].mxu0  ;;  %v1641_v54 = vadd.f32 %v2309_v15, %v3280_v26 }
 0x7ee   : > { %v1633_v49 = vadd.f32 %v1632_v4, %v3280_v26  ;;  %v2310_v21 = vpop.f32.mrb[46].mxu0 }
 0x7ef   : > { %1688 = vadd.xlane.f32.xlu0 %v1687_v5  ;;  %v1635_v28 = vpop.f32.mrb[47].mxu0  ;;  %v1644_v44 = vadd.f32 %v2310_v21, %v3280_v26  ;;  %v3370_v38 = vadd.f32 %v1641_v54, %v3044_v8 }
 0x7f0   : > { %v1636_v43 = vadd.f32 %v1635_v28, %v3280_v26  ;;  %v3357_v42 = vadd.f32 %v1633_v49, %v3031_v61 }
 0x7f1   : > { %1697 = vadd.xlane.f32.xlu1 %v1696_v50  ;;  %v3365_v36 = vadd.f32 %v1644_v44, %v3039_v39  ;;  %v1705_v26 = vsel %vm304_vm3, %v3370_v38, 0.0 }
 0x7f2   : > { %v3360_v52 = vadd.f32 %v1636_v43, %v3034_v19  ;;  %v1699_v61 = vsel %vm304_vm3, %v3357_v42, 0.0 }
 0x7f3   : > { %1694 = vadd.xlane.f32.xlu0 %v1693_v1  ;;  %v1708_v19 = vsel %vm304_vm3, %v3365_v36, 0.0 }
 0x7f4   : > { %v1702_v53 = vsel %vm304_vm3, %v3360_v52, 0.0 }
 0x7f5   : > { %1703 = vadd.xlane.f32.xlu1 %v1702_v53 }
 0x7f7   : > { %1700 = vadd.xlane.f32.xlu0 %v1699_v61 }
 0x7f9   : > { %1709 = vadd.xlane.f32.xlu1 %v1708_v19 }
 0x7fb   : > { %1706 = vadd.xlane.f32.xlu0 %v1705_v26 }
 0x868   : > { %v1665_v39 = vpop.xlane.xlu0 %1664 }
 0x869   : > { %v1711_v37 = vmul.f32 0.03125, %v1665_v39 }
 0x86a   : > { %v1668_v16 = vpop.xlane.xlu1 %1667 }
 0x86b   : > { %v3379_v9 = vsub.f32 %v3286_v7, %v1711_v37  ;;  %v1712_v8 = vmul.f32 0.03125, %v1668_v16 }
 0x86c   : > { %v1671_v33 = vpop.xlane.xlu0 %1670 }
 0x86d   : > { %v3382_v62 = vsub.f32 %v3290_v24, %v1712_v8  ;;  %v1713_v45 = vmul.f32 0.03125, %v1671_v33  ;;  %v1743_v31 = vmul.f32 %v3379_v9, %v3379_v9 }
 0x86f   : > { %v3387_v11 = vsub.f32 %v3295_v63, %v1713_v45  ;;  %v1759_v57 = vsel %vm304_vm3, %v1743_v31, 0.0  ;;  %v1744_v2 = vmul.f32 %v3382_v62, %v3382_v62 }
 0x870   : > { %1760 = vadd.xlane.f32.xlu0 %v1759_v57  ;;  %v1674_v7 = vpop.xlane.xlu0 %1673 }
 0x871   : > { %v1714_v18 = vmul.f32 0.03125, %v1674_v7  ;;  %v1762_v23 = vsel %vm304_vm3, %v1744_v2, 0.0  ;;  %v1745_v24 = vmul.f32 %v3387_v11, %v3387_v11 }
 0x872   : > { %v1680_v32 = vpop.xlane.xlu1 %1679  ;;  %1763 = vadd.xlane.f32.xlu1 %v1762_v23 }
 0x873   : > { %v3396_v25 = vsub.f32 %v3300_v20, %v1714_v18  ;;  %v1716_v63 = vmul.f32 0.03125, %v1680_v32  ;;  %v1765_v48 = vsel %vm304_vm3, %v1745_v24, 0.0 }
 0x874   : > { %1766 = vadd.xlane.f32.xlu0 %v1765_v48  ;;  %v1677_v29 = vpop.xlane.xlu0 %1676 }
 0x875   : > { %v3400_v35 = vsub.f32 %v3312_v55, %v1716_v63  ;;  %v1715_v27 = vmul.f32 0.03125, %v1677_v29  ;;  %v1746_v22 = vmul.f32 %v3396_v25, %v3396_v25 }
 0x876   : > { %v1686_v40 = vpop.xlane.xlu1 %1685 }
 0x877   : > { %v3405_v14 = vsub.f32 %v3309_v41, %v1715_v27  ;;  %v1718_v60 = vmul.f32 0.03125, %v1686_v40  ;;  %v1768_v20 = vsel %vm304_vm3, %v1746_v22, 0.0  ;;  %v1748_v12 = vmul.f32 %v3400_v35, %v3400_v35 }
 0x878   : > { %1769 = vadd.xlane.f32.xlu1 %v1768_v20  ;;  %v1683_v34 = vpop.xlane.xlu0 %1682  ;;  %v2553_v20 = vmov 0  }
 0x879   : > { %v3411_v56 = vsub.f32 %v3317_v10, %v1718_v60  ;;  %v1717_v55 = vmul.f32 0.03125, %v1683_v34  ;;  %v1747_v13 = vmul.f32 %v3405_v14, %v3405_v14  ;;  %v1774_v15 = vsel %vm304_vm3, %v1748_v12, 0.0  ;;  %v1937_v60 = vld [vmem:[%s3605_s1 + $0x6c] sm:$0x4]  ;;  %2375 = vset.pattern.permute.xlu0 %v2553_v20 }
 0x87a   : > { %v1692_v51 = vpop.xlane.xlu1 %1691  ;;  %v1938_v12 = vunpack.c.l.bf16 %v1937_v60 }
 0x87b   : > { %v3417_v41 = vsub.f32 %v3322_v3, %v1717_v55  ;;  %v1720_v59 = vmul.f32 0.03125, %v1692_v51  ;;  %v1771_v4 = vsel %vm304_vm3, %v1747_v13, 0.0  ;;  %v1750_v49 = vmul.f32 %v3411_v56, %v3411_v56 }
 0x87c   : > { %1775 = vadd.xlane.f32.xlu1 %v1774_v15  ;;  %1772 = vadd.xlane.f32.xlu0 %v1771_v4  ;;  %v1689_v10 = vpop.xlane.xlu0 %1688 }
 0x87d   : > { %v3423_v21 = vsub.f32 %v3336_v47, %v1720_v59  ;;  %v1719_v5 = vmul.f32 0.03125, %v1689_v10  ;;  %v1749_v28 = vmul.f32 %v3417_v41, %v3417_v41  ;;  %v1780_v3 = vsel %vm304_vm3, %v1750_v49, 0.0  ;;  %v1871_v10 = vld [vmem:[%s3605_s1 + $0x6c] sm:$0x2] }
 0x87e   : > { %v1698_v44 = vpop.xlane.xlu1 %1697 }
 0x87f   : > { %v3429_v43 = vsub.f32 %v3333_v6, %v1719_v5  ;;  %v1722_v50 = vmul.f32 0.03125, %v1698_v44  ;;  %v1777_v54 = vsel %vm304_vm3, %v1749_v28, 0.0  ;;  %v1752_v1 = vmul.f32 %v3423_v21, %v3423_v21 }
 0x880   : > { %1781 = vadd.xlane.f32.xlu1 %v1780_v3  ;;  %1778 = vadd.xlane.f32.xlu0 %v1777_v54  ;;  %v1695_v47 = vpop.xlane.xlu0 %1694  ;;  %v1872_v3 = vunpack.c.l.bf16 %v1871_v10 }
 0x881   : > { %v3435_v53 = vsub.f32 %v3341_v0, %v1722_v50  ;;  %v1721_v61 = vmul.f32 0.03125, %v1695_v47  ;;  %v1751_v19 = vmul.f32 %v3429_v43, %v3429_v43  ;;  %v1786_v6 = vsel %vm304_vm3, %v1752_v1, 0.0 }
 0x882   : > { %v1704_v26 = vpop.xlane.xlu1 %1703 }
 0x883   : > { %v3441_v39 = vsub.f32 %v3346_v46, %v1721_v61  ;;  %v1724_v37 = vmul.f32 0.03125, %v1704_v26  ;;  %v1783_v16 = vsel %vm304_vm3, %v1751_v19, 0.0  ;;  %v1754_v8 = vmul.f32 %v3435_v53, %v3435_v53 }
 0x884   : > { %1787 = vadd.xlane.f32.xlu1 %v1786_v6  ;;  %1784 = vadd.xlane.f32.xlu0 %v1783_v16  ;;  %v1701_v0 = vpop.xlane.xlu0 %1700  ;;  %v3484_v19 = vrot.slane %v1872_v3, %v518_v58  ;;  %v3488_v16 = vrot.slane %v1872_v3, %v538_v17 }
 0x885   : > { %v3447_v33 = vsub.f32 %v3360_v52, %v1724_v37  ;;  %v1723_v45 = vmul.f32 0.03125, %v1701_v0  ;;  %v1753_v31 = vmul.f32 %v3441_v39, %v3441_v39  ;;  %v1792_v46 = vsel %vm304_vm3, %v1754_v8, 0.0 }
 0x886   : > { %v1710_v57 = vpop.xlane.xlu1 %1709 }
 0x887   : > { %v3453_v2 = vsub.f32 %v3357_v42, %v1723_v45  ;;  %v1726_v7 = vmul.f32 0.03125, %v1710_v57  ;;  %v1789_v18 = vsel %vm304_vm3, %v1753_v31, 0.0  ;;  %v1756_v23 = vmul.f32 %v3447_v33, %v3447_v33 }
 0x888   : > { %1793 = vadd.xlane.f32.xlu1 %v1792_v46  ;;  %1790 = vadd.xlane.f32.xlu0 %v1789_v18  ;;  %v1707_v52 = vpop.xlane.xlu0 %1706 }
 0x889   : > { %v3459_v24 = vsub.f32 %v3365_v36, %v1726_v7  ;;  %v1725_v32 = vmul.f32 0.03125, %v1707_v52  ;;  %v1755_v63 = vmul.f32 %v3453_v2, %v3453_v2  ;;  %v1798_v42 = vsel %vm304_vm3, %v1756_v23, 0.0 }
 0x88b   : > { %v3464_v48 = vsub.f32 %v3370_v38, %v1725_v32  ;;  %v1795_v29 = vsel %vm304_vm3, %v1755_v63, 0.0  ;;  %v1758_v27 = vmul.f32 %v3459_v24, %v3459_v24  ;;  %v2551_v38 = vmov 0.0  }
 0x88c   : > { %1799 = vadd.xlane.f32.xlu1 %v1798_v42  ;;  %1796 = vadd.xlane.f32.xlu0 %v1795_v29 }
 0x88d   : > { %v1757_v36 = vmul.f32 %v3464_v48, %v3464_v48  ;;  %v1804_v22 = vsel %vm304_vm3, %v1758_v27, 0.0  ;;  %2311 = vmatprep.subr.bf16.mxu1 %v2551_v38  ;;  %2327 = vmatprep.mubr.msk.bf16.mxu1 %vm2552_vm5, %v2551_v38 }
 0x88f   : > { %v1801_v40 = vsel %vm304_vm3, %v1757_v36, 0.0 }
 0x890   : > { %1805 = vadd.xlane.f32.xlu1 %v1804_v22  ;;  %1802 = vadd.xlane.f32.xlu0 %v1801_v40 }
 0x8a6   : > { %1941 = vperm.xlu0 %2375, %v1938_v12  }
 0x8fd   : > { %v1761_v34 = vpop.xlane.xlu0 %1760 }
 0x8fe   : > { %v1807_v55 = vmul.f32 0.03125, %v1761_v34 }
 0x8ff   : > { %v1764_v13 = vpop.xlane.xlu1 %1763 }
 0x900   : > { %v1823_v51 = vadd.f32 1e-05, %v1807_v55  ;;  %v1808_v15 = vmul.f32 0.03125, %v1764_v13 }
 0x901   : > { %v1767_v59 = vpop.xlane.xlu0 %1766 }
 0x902   : > { %2452 = vrsqrt.f32 %v1823_v51  ;;  %v1824_v4 = vadd.f32 1e-05, %v1808_v15  ;;  %v1809_v49 = vmul.f32 0.03125, %v1767_v59 }
 0x904   : > { %2454 = vrsqrt.f32 %v1824_v4  ;;  %v1825_v5 = vadd.f32 1e-05, %v1809_v49 }
 0x905   : > { %v1770_v28 = vpop.xlane.xlu1 %1769 }
 0x906   : > { %2456 = vrsqrt.f32 %v1825_v5  ;;  %v1810_v44 = vmul.f32 0.03125, %v1770_v28 }
 0x908   : > { %v1826_v50 = vadd.f32 1e-05, %v1810_v44 }
 0x909   : > { %v1776_v54 = vpop.xlane.xlu1 %1775  ;;  %v1773_v1 = vpop.xlane.xlu0 %1772 }
 0x90a   : > { %2458 = vrsqrt.f32 %v1826_v50  ;;  %v1812_v47 = vmul.f32 0.03125, %v1776_v54  ;;  %v1811_v61 = vmul.f32 0.03125, %v1773_v1 }
 0x90c   : > { %v2453_v26 = vpop.eup %2452  ;;  %v1828_v6 = vadd.f32 1e-05, %v1812_v47  ;;  %v1827_v37 = vadd.f32 1e-05, %v1811_v61 }
 0x90d   : > { %v1782_v8 = vpop.xlane.xlu1 %1781  ;;  %v1779_v0 = vpop.xlane.xlu0 %1778  ;;  %v1855_v45 = vmul.f32 %v2453_v26, %v3379_v9 }
 0x90e   : > { %v2455_v31 = vpop.eup %2454  ;;  %2460 = vrsqrt.f32 %v1828_v6  ;;  %v1814_v57 = vmul.f32 0.03125, %v1782_v8  ;;  %v1813_v46 = vmul.f32 0.03125, %v1779_v0 }
 0x90f   : > { %2462 = vrsqrt.f32 %v1827_v37  ;;  %v1856_v7 = vmul.f32 %v2455_v31, %v3382_v62  ;;  %v1877_v58 = vmul.f32 %v3484_v19, %v1855_v45 }
 0x910   : > { %v2457_v18 = vpop.eup %2456  ;;  %v1830_v23 = vadd.f32 1e-05, %v1814_v57  ;;  %v1829_v52 = vadd.f32 1e-05, %v1813_v46 }
 0x911   : > { %v1788_v32 = vpop.xlane.xlu1 %1787  ;;  %v1785_v30 = vpop.xlane.xlu0 %1784  ;;  %v1878_v17 = vmul.f32 %v3484_v19, %v1856_v7  ;;  %v1897_v63 = vadd.f32 %v3488_v16, %v1877_v58  ;;  %v1857_v9 = vmul.f32 %v2457_v18, %v3387_v11 }
 0x912   : > { %2464 = vrsqrt.f32 %v1830_v23  ;;  %v1816_v42 = vmul.f32 0.03125, %v1788_v32  ;;  %v1815_v29 = vmul.f32 0.03125, %v1785_v30 }
 0x913   : > { %2466 = vrsqrt.f32 %v1829_v52  ;;  %v1898_v27 = vadd.f32 %v3488_v16, %v1878_v17  ;;  %v1879_v62 = vmul.f32 %v3484_v19, %v1857_v9  ;;  %v1913_v12 = vmax.f32 %v1897_v63, 0.0 }
 0x914   : > { %v2459_v36 = vpop.eup %2458  ;;  %v1832_v22 = vadd.f32 1e-05, %v1816_v42  ;;  %v1831_v40 = vadd.f32 1e-05, %v1815_v29 }
 0x915   : > { %v1794_v60 = vpop.xlane.xlu1 %1793  ;;  %v1791_v20 = vpop.xlane.xlu0 %1790  ;;  %v1914_v34 = vmax.f32 %v1898_v27, 0.0  ;;  %v1858_v55 = vmul.f32 %v2459_v36, %v3396_v25  ;;  %v1899_v13 = vadd.f32 %v3488_v16, %v1879_v62 }
 0x916   : > { %2468 = vrsqrt.f32 %v1832_v22  ;;  %v1818_v11 = vmul.f32 0.03125, %v1794_v60  ;;  %v1817_v51 = vmul.f32 0.03125, %v1791_v20 }
 0x917   : > { %2470 = vrsqrt.f32 %v1831_v40  ;;  %v1929_v15 = vpack.c.bf16 %v1914_v34, %v1913_v12  ;;  %v1880_v59 = vmul.f32 %v3484_v19, %v1858_v55  ;;  %v1915_v61 = vmax.f32 %v1899_v13, 0.0 }
 0x918   : > { %v2461_v4 = vpop.eup %2460  ;;  %v1834_v49 = vadd.f32 1e-05, %v1818_v11  ;;  %v1833_v10 = vadd.f32 1e-05, %v1817_v51 }
 0x919   : > { %v2463_v5 = vpop.eup %2462  ;;  %v1800_v28 = vpop.xlane.xlu1 %1799  ;;  %v1949_v3 = vsel %vm304_vm3, %v1929_v15, 0  ;;  %v1900_v50 = vadd.f32 %v3488_v16, %v1880_v59  ;;  %v1860_v25 = vmul.f32 %v2461_v4, %v3400_v35 }
 0x91a   : > { %v1797_v44 = vpop.xlane.xlu0 %1796  ;;  %2472 = vrsqrt.f32 %v1834_v49  ;;  %v1820_v54 = vmul.f32 0.03125, %v1800_v28  ;;  %2312 = vmatpush3.bf16.xpose.msra.mxu1 %v1949_v3  ;;  %v1859_v47 = vmul.f32 %v2463_v5, %v3405_v14 }
 0x91b   : > { %v1819_v1 = vmul.f32 0.03125, %v1797_v44  ;;  %2474 = vrsqrt.f32 %v1833_v10  ;;  %2313 = vmatprep.subr.bf16.mxu1 %v2551_v38  ;;  %v1916_v26 = vmax.f32 %v1900_v50, 0.0  ;;  %v1882_v6 = vmul.f32 %v3484_v19, %v1860_v25 }
 0x91c   : > { %v2465_v37 = vpop.eup %2464  ;;  %v1836_v8 = vadd.f32 1e-05, %v1820_v54  ;;  %v1881_v45 = vmul.f32 %v3484_v19, %v1859_v47 }
 0x91d   : > { %v1835_v0 = vadd.f32 1e-05, %v1819_v1  ;;  %v2467_v31 = vpop.eup %2466  ;;  %v1806_v35 = vpop.xlane.xlu1 %1805  ;;  %v1930_v46 = vpack.c.bf16 %v1916_v26, %v1915_v61  ;;  %v1902_v7 = vadd.f32 %v3488_v16, %v1882_v6  ;;  %v1862_v14 = vmul.f32 %v2465_v37, %v3411_v56 }
 0x91e   : > { %v1803_v57 = vpop.xlane.xlu0 %1802  ;;  %2476 = vrsqrt.f32 %v1836_v8  ;;  %v1822_v58 = vmul.f32 0.03125, %v1806_v35  ;;  %v1901_v23 = vadd.f32 %v3488_v16, %v1881_v45  ;;  %v1861_v32 = vmul.f32 %v2467_v31, %v3417_v41 }
 0x91f   : > { %v1821_v18 = vmul.f32 0.03125, %v1803_v57  ;;  %2478 = vrsqrt.f32 %v1835_v0  ;;  %v1918_v52 = vmax.f32 %v1902_v7, 0.0  ;;  %v1884_v42 = vmul.f32 %v3484_v19, %v1862_v14 }
 0x920   : > { %v2469_v30 = vpop.eup %2468  ;;  %v1838_v17 = vadd.f32 1e-05, %v1822_v58  ;;  %v1917_v9 = vmax.f32 %v1901_v23, 0.0  ;;  %v1952_v27 = vsel %vm304_vm3, %v1930_v46, 0  ;;  %v1883_v56 = vmul.f32 %v3484_v19, %v1861_v32  ;;  %v2484_v32 = vld [vmem:[%s3605_s1 + $0x68] sm:$0x1] }
 0x921   : > { %v1837_v63 = vadd.f32 1e-05, %v1821_v18  ;;  %v2471_v29 = vpop.eup %2470  ;;  %v1864_v62 = vmul.f32 %v2469_v30, %v3423_v21  ;;  %v1904_v22 = vadd.f32 %v3488_v16, %v1884_v42 }
 0x922   : > { %2480 = vrsqrt.f32 %v1838_v17  ;;  %2314 = vmatpush3.bf16.xpose.msra.mxu1 %v1952_v27  ;;  %v1931_v36 = vpack.c.bf16 %v1918_v52, %v1917_v9  ;;  %v1863_v41 = vmul.f32 %v2471_v29, %v3429_v43  ;;  %v1903_v40 = vadd.f32 %v3488_v16, %v1883_v56 }
 0x923   : > { %2482 = vrsqrt.f32 %v1837_v63  ;;  %2315 = vmatprep.subr.bf16.mxu1 %v2551_v38  ;;  %v1886_v60 = vmul.f32 %v3484_v19, %v1864_v62  ;;  %v1920_v12 = vmax.f32 %v1904_v22, 0.0 }
 0x924   : > { %v2473_v20 = vpop.eup %2472  ;;  %v1885_v34 = vmul.f32 %v3484_v19, %v1863_v41  ;;  %v1919_v21 = vmax.f32 %v1903_v40, 0.0  ;;  %v1955_v44 = vsel %vm304_vm3, %v1931_v36, 0 }
 0x925   : > { %v2475_v55 = vpop.eup %2474  ;;  %v1906_v13 = vadd.f32 %v3488_v16, %v1886_v60  ;;  %v1866_v11 = vmul.f32 %v2473_v20, %v3435_v53  ;;  %v1942_v30 = vpop.permute.xlu0 %1941 }
 0x926   : > { %v1905_v51 = vadd.f32 %v3488_v16, %v1885_v34  ;;  %v1865_v43 = vmul.f32 %v2475_v55, %v3441_v39  ;;  %v1932_v15 = vpack.c.bf16 %v1920_v12, %v1919_v21  ;;  %v1943_v17 = vrot.slane %v1942_v30, 4 }
 0x927   : > { %v1922_v59 = vmax.f32 %v1906_v13, 0.0  ;;  %v1888_v4 = vmul.f32 %v3484_v19, %v1866_v11 }
 0x928   : > { %v2477_v49 = vpop.eup %2476  ;;  %v1921_v10 = vmax.f32 %v1905_v51, 0.0  ;;  %v1887_v5 = vmul.f32 %v3484_v19, %v1865_v43  ;;  %v1958_v46 = vsel %vm304_vm3, %v1932_v15, 0 }
 0x929   : > { %v2479_v28 = vpop.eup %2478  ;;  %v1908_v3 = vadd.f32 %v3488_v16, %v1888_v4  ;;  %v1868_v50 = vmul.f32 %v2477_v49, %v3447_v33 }
 0x92a   : > { %2316 = vmatpush3.bf16.xpose.msra.mxu1 %v1955_v44  ;;  %v1933_v53 = vpack.c.bf16 %v1922_v59, %v1921_v10  ;;  %v1907_v25 = vadd.f32 %v3488_v16, %v1887_v5  ;;  %v1867_v39 = vmul.f32 %v2479_v28, %v3453_v2 }
 0x92b   : > { %2317 = vmatprep.subr.bf16.mxu1 %v2551_v38  ;;  %v1924_v54 = vmax.f32 %v1908_v3, 0.0  ;;  %v1890_v1 = vmul.f32 %v3484_v19, %v1868_v50 }
 0x92c   : > { %v2481_v47 = vpop.eup %2480  ;;  %v1923_v61 = vmax.f32 %v1907_v25, 0.0  ;;  %v1889_v26 = vmul.f32 %v3484_v19, %v1867_v39  ;;  %v1961_v23 = vsel %vm304_vm3, %v1933_v53, 0 }
 0x92d   : > { %v2483_v6 = vpop.eup %2482  ;;  %v1870_v37 = vmul.f32 %v2481_v47, %v3459_v24  ;;  %v1910_v33 = vadd.f32 %v3488_v16, %v1890_v1 }
 0x92e   : > { %v1934_v8 = vpack.c.bf16 %v1924_v54, %v1923_v61  ;;  %v1909_v0 = vadd.f32 %v3488_v16, %v1889_v26  ;;  %v1869_v45 = vmul.f32 %v2483_v6, %v3464_v48 }
 0x92f   : > { %v1926_v2 = vmax.f32 %v1910_v33, 0.0  ;;  %v1892_v31 = vmul.f32 %v3484_v19, %v1870_v37 }
 0x930   : > { %v1925_v35 = vmax.f32 %v1909_v0, 0.0  ;;  %v1891_v57 = vmul.f32 %v3484_v19, %v1869_v45  ;;  %v1964_v19 = vsel %vm304_vm3, %v1934_v8, 0 }
 0x931   : > { %v1912_v7 = vadd.f32 %v3488_v16, %v1892_v31 }
 0x932   : > { %2318 = vmatpush3.bf16.xpose.msra.mxu1 %v1958_v46  ;;  %v1935_v14 = vpack.c.bf16 %v1926_v2, %v1925_v35  ;;  %v1911_v24 = vadd.f32 %v3488_v16, %v1891_v57 }
 0x933   : > { %2319 = vmatprep.subr.bf16.mxu1 %v2551_v38  ;;  %v1928_v58 = vmax.f32 %v1912_v7, 0.0 }
 0x934   : > { %v1927_v18 = vmax.f32 %v1911_v24, 0.0  ;;  %v1967_v52 = vsel %vm304_vm3, %v1935_v14, 0 }
 0x936   : > { %v1936_v48 = vpack.c.bf16 %v1928_v58, %v1927_v18 }
 0x938   : > { %v1970_v16 = vsel %vm304_vm3, %v1936_v48, 0 }
 0x93a   : > { %2320 = vmatpush3.bf16.xpose.msra.mxu1 %v1961_v23 }
 0x93b   : > { %2321 = vmatprep.subr.bf16.mxu1 %v2551_v38 }
 0x942   : > { %2322 = vmatpush3.bf16.xpose.msra.mxu1 %v1964_v19 }
 0x943   : > { %2323 = vmatprep.subr.bf16.mxu1 %v2551_v38 }
 0x94a   : > { %2324 = vmatpush3.bf16.xpose.msra.mxu1 %v1967_v52 }
 0x94b   : > { %2325 = vmatprep.subr.bf16.mxu1 %v2551_v38 }
 0x952   : > { %2326 = vmatpush3.bf16.xpose.msra.mxu1 %v1970_v16 }
 0x959   : > { %2328 = vmatmul.mubr.msk.bf16.vlgmr.msra.gmra.mrb[32].mxu1 %vm304_vm3, %v2484_v32 }
 0xa2c   : > { %v2006_v63 = vpop.f32.mrb[32].mxu1 }
 0xa2d   : > { %v2007_v9 = vadd.f32 %v2006_v63, %v1943_v17  ;;  %v2329_v42 = vpop.f32.mrb[33].mxu1 }
 0xa2e   : > { %v2009_v38 = vpop.f32.mrb[34].mxu1 }
 0xa2f   : > { %2012 = vst [vmem:[%s136_s5] sm:$0x1] %v2007_v9  ;;  %v2330_v29 = vpop.f32.mrb[35].mxu1 }
 0xa30   : > { %2498 = shalt.err (!%p2495_p3)
}
 0xa31   : > { %s2499_s23 = scalar_lea.hbm %s3562_s13, 16  ;;  %s2503_s26 = scalar_lea.hbm %s3606_s2, 32 }
 0xa32   : > { %p2500_p4 = scmp.ne.s32.totalorder %s3562_s13, %s2499_s23  ;;  %p2504_p9 = scmp.lt.u32.totalorder %s3562_s13, %s3606_s2 }
 0xa33   : > { %p2505_p10 = scmp.lt.u32.totalorder %s2503_s26, %s2499_s23  ;;  %p2507_p12 = scmp.lt.u32.totalorder %s2499_s23, %s3562_s13 }
 0xa34   : > { %p2501_p7 = pnand %p2500_p4, %p2605_p5 }
 0xa35   : > { %p2506_p11 = por %p2505_p10, %p2504_p9 }
 0xa36   : > { %p2502_p8 = pneg %p2501_p7 }
 0xa37   : > { %p2508_p13 = por %p2507_p12, %p2506_p11 }
 0xa39   : > { %p2509_p0 = pnand %p2508_p13, %p2502_p8 }
 0xa3b   : > { %2512 = shalt.err (!%p2509_p0)
}
 0xa3c   : > { %2331 = dma.vmem_to_hbm [thread:$0]  (%p2605_p5), %s3564_s6, 16, %s3562_s13, %s2014_s14  }
 0xa3d PF: > { %p2337_p1 = scmp.ge.s32.totalorder %s2547_s12, 2  ;;  %s2038_s29 = sand.u32 1, %s2535_s9  }
 0xa3e   : > { %s2039_s30 = scalar_lea.sflag [#allocation3], %s2038_s29 }
 0xa3f   : > { %p2334_p2 = pnand %p2337_p1, %p2609_p6 }
 0xa41   : > { %2530 = dma.done.wait (!%p2334_p2), %s2039_s30, 16  }
 0xa42   : > { %2532 = vsyncadd (!%p2334_p2), %s2039_s30, 4294967280  ;;  %p12_p3 = scmp.ge.s32.totalorder %s2593_s15, 4   ;;  %s3609_s9 = smov %s2539_s10 }
 0xa43   : > { %s3610_s10 = smov %s2543_s11  ;;  %s3611_s11 = smov %s2603_s18 }
 0xa44   : > { %s3612_s12 = smov %s2593_s15  ;;  %14 = sbr.rel (!%p12_p3) target bundleno = 3 (0x3), region = 63 }
 0xa4b   :  { %2043 = vsyncpa [#allocation3], 1 }
 0xa4c   :  { %2045 = vsyncpa [#allocation3 + $0x1], 1 }

</bundles_post_ra>
